<compile_context>
chip_gen: v7x
topology: tpu7x:2x2x1
jax: 0.10.0
libtpu: 0.0.40
codegen_flags: <defaults>
</compile_context>

<pallas_src>
import math
from functools import partial

import jax
import jax.numpy as jnp
from jax.experimental import pallas as pl
from jax.experimental.pallas import tpu as pltpu


def _cp_kernel(W, PT,
               x_ref, wq_ref, pool_ref, bcast_ref,
               w1_ref, b1_ref, wdw_ref, bdw_ref, gamma_ref,
               w2_ref, b2_ref, lnw_ref, lnb_ref, temp_ref, cmask_ref,
               out_ref, pad_ref):
    N = x_ref.shape[1]
    C = x_ref.shape[2]
    Hd = w1_ref.shape[1]

    x = x_ref[0]                                          # (N, C) f32
    x_bf = x.astype(jnp.bfloat16)

    # ---------------- q projection: bf16 MXU operands, f32 accumulate ----------------
    q = jnp.dot(x_bf, wq_ref[...], preferred_element_type=jnp.float32)      # (N, C)

    # ---------------- channel attention ----------------
    # k branch: softmax over tokens (axis 0), per-head mean over head_dim, broadcast
    # back to the head's channels via two tiny matmuls against precomputed constants.
    e_k = jnp.exp(x - jnp.max(x, axis=0, keepdims=True))
    k_sm = e_k * pl.reciprocal(jnp.sum(e_k, axis=0, keepdims=True), approx=True)
    k_mean = jnp.dot(k_sm, pool_ref[...], preferred_element_type=jnp.float32)     # (N, heads)
    k_bcast = jnp.dot(k_mean, bcast_ref[...], preferred_element_type=jnp.float32)  # (N, C)

    # q branch: softmax over tokens folded into the reduction:
    #   sum_n softmax(q)[n,c] * k_bcast[n,c] == (sum_n e_q*k_bcast) * (1 / sum_n e_q)
    e_q = jnp.exp(q - jnp.max(q, axis=0, keepdims=True))
    logits = (jnp.sum(e_q * k_bcast, axis=0, keepdims=True)
              * pl.reciprocal(jnp.sum(e_q, axis=0, keepdims=True), approx=True))   # (1, C)
    attn = jax.nn.sigmoid(logits) * temp_ref[...]                                  # (1, C)

    # ---------------- Mlp: fc1 -> 3x3 depthwise conv -> gamma*GELU -> fc2 ----------------
    hid = jnp.dot(x_bf, w1_ref[...], preferred_element_type=jnp.float32) + b1_ref[...]   # (N, Hd)

    # Zero-padded token axis in VMEM scratch: row PT+n holds token n, the PT-row borders
    # stay zero so vertically out-of-range taps contribute 0 (no concat/zero temporaries).
    pad_ref[0:PT, :] = jnp.zeros((PT, Hd), jnp.float32)
    pad_ref[PT + N:PT + N + PT, :] = jnp.zeros((PT, Hd), jnp.float32)
    pad_ref[PT:PT + N, :] = hid

    wdw = wdw_ref[...]                                    # (9, Hd) tap weights
    cm_l = cmask_ref[:, 0:1]                              # (N,1): x-1 >= 0
    cm_r = cmask_ref[:, 1:2]                              # (N,1): x+1 <= W-1

    def tap(dy, dx):
        s = dy * W + dx
        j = 3 * (dy + 1) + (dx + 1)
        return wdw[j:j + 1, :] * pad_ref[PT + s:PT + s + N, :]

    mid = tap(-1, 0) + tap(0, 0) + tap(1, 0)
    left = tap(-1, -1) + tap(0, -1) + tap(1, -1)
    right = tap(-1, 1) + tap(0, 1) + tap(1, 1)
    conv = mid + cm_l * left + cm_r * right + bdw_ref[...]

    # TODO(synk): GELU uses the tanh approximation (PyTorch nn.GELU default is exact erf).
    act = gamma_ref[...] * jax.nn.gelu(conv, approximate=True)                  # (N, Hd)
    vm = jnp.dot(act.astype(jnp.bfloat16), w2_ref[...],
                 preferred_element_type=jnp.float32) + b2_ref[...]              # (N, C)

    # ---------------- LayerNorm over channels ----------------
    mu = jnp.mean(vm, axis=1, keepdims=True)
    var = jnp.mean(jnp.square(vm - mu), axis=1, keepdims=True)
    v_norm = (vm - mu) * jax.lax.rsqrt(var + 1e-5) * lnw_ref[...] + lnb_ref[...]

    # ---------------- output ----------------
    out_ref[0] = (v_norm * attn).astype(out_ref.dtype)


def channel_processing_forward(x, params, *, H, W, num_heads):
    B, N, C = x.shape
    Hd = params["w1"].shape[1]
    dh = C // num_heads
    assert N == H * W and C % num_heads == 0

    f32 = jnp.float32
    bf16 = jnp.bfloat16

    # ---- grid-invariant constants, built once outside the kernel ----
    heads_of_c = jnp.arange(C, dtype=jnp.int32) // dh                       # (C,)
    head_ids = jnp.arange(num_heads, dtype=jnp.int32)                       # (heads,)
    pool_mat = (heads_of_c[:, None] == head_ids[None, :]).astype(f32) / dh  # (C, heads)
    bcast_mat = (head_ids[:, None] == heads_of_c[None, :]).astype(f32)      # (heads, C)

    xcol = jnp.arange(N, dtype=jnp.int32) % W
    cmask = jnp.stack([(xcol >= 1).astype(f32),
                       (xcol <= W - 2).astype(f32)], axis=1)                # (N, 2)

    # per-channel temperature (head-major channel layout c = h*dh + d)
    temp_c = jnp.repeat(params["temperature"].reshape(num_heads), dh)[None, :]

    # bf16 weights for the MXU (accumulation stays f32 inside the kernel)
    wq = params["wq"].astype(bf16)
    w1 = params["w1"].astype(bf16)
    w2 = params["w2"].astype(bf16)

    # padded-conv scratch geometry: top pad rounded to a sublane multiple, >= W+1
    PT = ((W + 1 + 7) // 8) * 8

    kernel = partial(_cp_kernel, W, PT)

    def inv(shape):  # grid-invariant full-array block
        return pl.BlockSpec(shape, lambda b: (0, 0))

    in_specs = [
        pl.BlockSpec((1, N, C), lambda b: (b, 0, 0)),   # x
        inv((C, C)),                                    # Wq (bf16)
        inv((C, num_heads)),                            # per-head pooling matrix
        inv((num_heads, C)),                            # per-head broadcast matrix
        inv((C, Hd)), inv((1, Hd)),                     # fc1 weight / bias
        inv((9, Hd)), inv((1, Hd)),                     # dwconv weight / bias
        inv((1, Hd)),                                   # gamma
        inv((Hd, C)), inv((1, C)),                      # fc2 weight / bias
        inv((1, C)), inv((1, C)),                       # LayerNorm weight / bias
        inv((1, C)),                                    # temperature (per channel)
        inv((N, 2)),                                    # conv horizontal edge masks
    ]
    out_specs = pl.BlockSpec((1, N, C), lambda b: (b, 0, 0))
    out_shape = jax.ShapeDtypeStruct((B, N, C), jnp.float32)

    # Explicit VMEM budget: double-buffered x/out blocks + weights/constants +
    # conv scratch + intermediates, with headroom; clamped to sane bounds.
    io_bytes = 2 * 2 * N * C * 4
    w_bytes = 2 * ((C * C + C * Hd + Hd * C) * 2
                   + (9 * Hd + 3 * Hd + 4 * C + C * num_heads + num_heads * C + 2 * N) * 4)
    scratch_bytes = (N + 2 * PT) * Hd * 4
    interm_bytes = 10 * N * max(C, Hd) * 4
    vmem_limit = int(min(max(2 * (io_bytes + w_bytes + scratch_bytes + interm_bytes),
                             32 << 20), 100 << 20))

    out1 = pl.pallas_call(
        kernel,
        out_shape=out_shape,
        grid=(B,),
        in_specs=in_specs,
        out_specs=out_specs,
        scratch_shapes=[pltpu.VMEM((N + 2 * PT, Hd), jnp.float32)],
        compiler_params=pltpu.CompilerParams(
            dimension_semantics=("parallel",),
            vmem_limit_bytes=vmem_limit),
    )(x, wq, pool_mat, bcast_mat, w1, params["b1"], params["wdw"], params["bdw"],
      params["gamma"], w2, params["b2"], params["ln_w"], params["ln_b"],
      temp_c, cmask)

    # Second output (attn * v^T, shape (B, heads, dh, N)) is a pure layout permutation
    # of out1; produce it with a cheap XLA transpose instead of a second masked,
    # transposed store inside the kernel (halves kernel HBM writeback).
    attn_v = jnp.transpose(out1.reshape(B, N, num_heads, dh), (0, 2, 3, 1))
    return out1, attn_v


if __name__ == "__main__":
    B, H, W = 2, 8, 8
    dim, num_heads, mlp_hidden = 32, 8, 64
    N = H * W
    dh = dim // num_heads

    key = jax.random.PRNGKey(0)
    ks = jax.random.split(key, 6)

    x = jax.random.normal(ks[0], (B, N, dim), dtype=jnp.float32)

    params = dict(
        # Linear weights: trunc_normal(std=0.02) approximated by normal*0.02; biases 0.
        wq=0.02 * jax.random.normal(ks[1], (dim, dim), jnp.float32),
        w1=0.02 * jax.random.normal(ks[2], (dim, mlp_hidden), jnp.float32),
        b1=jnp.zeros((1, mlp_hidden), jnp.float32),
        # depthwise conv: normal(0, sqrt(2/fan_out)), fan_out = 3*3*Hd/Hd = 9
        wdw=math.sqrt(2.0 / 9.0) * jax.random.normal(ks[3], (9, mlp_hidden), jnp.float32),
        bdw=jnp.zeros((1, mlp_hidden), jnp.float32),
        gamma=jnp.ones((1, mlp_hidden), jnp.float32),
        w2=0.02 * jax.random.normal(ks[4], (mlp_hidden, dim), jnp.float32),
        b2=jnp.zeros((1, dim), jnp.float32),
        ln_w=jnp.ones((1, dim), jnp.float32),
        ln_b=jnp.zeros((1, dim), jnp.float32),
        # temperature: nn.Parameter(torch.ones(num_heads, 1, 1))
        temperature=jnp.ones((num_heads, 1, 1), jnp.float32),
    )

    out1, attn_v = channel_processing_forward(x, params, H=H, W=W, num_heads=num_heads)
    jax.block_until_ready((out1, attn_v))
    assert out1.shape == (B, N, dim)
    assert attn_v.shape == (B, num_heads, dh, N)
    print("KERNEL_OK")
</pallas_src>

<mosaic_0001>
module attributes {stable_mosaic.version = 11 : i64} {
  func.func @_cp_kernel(%arg0: i32, %arg1: memref<1x64x32xf32, #tpu.memory_space<vmem>>, %arg2: memref<32x32xbf16, #tpu.memory_space<vmem>>, %arg3: memref<32x8xf32, #tpu.memory_space<vmem>>, %arg4: memref<8x32xf32, #tpu.memory_space<vmem>>, %arg5: memref<32x64xbf16, #tpu.memory_space<vmem>>, %arg6: memref<1x64xf32, #tpu.memory_space<vmem>>, %arg7: memref<9x64xf32, #tpu.memory_space<vmem>>, %arg8: memref<1x64xf32, #tpu.memory_space<vmem>>, %arg9: memref<1x64xf32, #tpu.memory_space<vmem>>, %arg10: memref<64x32xbf16, #tpu.memory_space<vmem>>, %arg11: memref<1x32xf32, #tpu.memory_space<vmem>>, %arg12: memref<1x32xf32, #tpu.memory_space<vmem>>, %arg13: memref<1x32xf32, #tpu.memory_space<vmem>>, %arg14: memref<1x32xf32, #tpu.memory_space<vmem>>, %arg15: memref<64x2xf32, #tpu.memory_space<vmem>>, %arg16: memref<1x64x32xf32, #tpu.memory_space<vmem>>, %arg17: memref<96x64xf32, #tpu.memory_space<vmem>>) attributes {dimension_semantics = [#tpu.dimension_semantics<parallel>], iteration_bounds = array<i64: 2>, scalar_prefetch = 0 : i64, scratch_operands = 1 : i64, tpu.core_type = #tpu.core_type<tc>, window_params = [{transform_indices = @transform_0, window_bounds = array<i64: 1, 64, 32>}, {pipeline_mode = #tpu.pipeline_mode<synchronous>, transform_indices = @transform_1, window_bounds = array<i64: 32, 32>}, {pipeline_mode = #tpu.pipeline_mode<synchronous>, transform_indices = @transform_2, window_bounds = array<i64: 32, 8>}, {pipeline_mode = #tpu.pipeline_mode<synchronous>, transform_indices = @transform_3, window_bounds = array<i64: 8, 32>}, {pipeline_mode = #tpu.pipeline_mode<synchronous>, transform_indices = @transform_4, window_bounds = array<i64: 32, 64>}, {pipeline_mode = #tpu.pipeline_mode<synchronous>, transform_indices = @transform_5, window_bounds = array<i64: 1, 64>}, {pipeline_mode = #tpu.pipeline_mode<synchronous>, transform_indices = @transform_6, window_bounds = array<i64: 9, 64>}, {pipeline_mode = #tpu.pipeline_mode<synchronous>, transform_indices = @transform_7, window_bounds = array<i64: 1, 64>}, {pipeline_mode = #tpu.pipeline_mode<synchronous>, transform_indices = @transform_8, window_bounds = array<i64: 1, 64>}, {pipeline_mode = #tpu.pipeline_mode<synchronous>, transform_indices = @transform_9, window_bounds = array<i64: 64, 32>}, {pipeline_mode = #tpu.pipeline_mode<synchronous>, transform_indices = @transform_10, window_bounds = array<i64: 1, 32>}, {pipeline_mode = #tpu.pipeline_mode<synchronous>, transform_indices = @transform_11, window_bounds = array<i64: 1, 32>}, {pipeline_mode = #tpu.pipeline_mode<synchronous>, transform_indices = @transform_12, window_bounds = array<i64: 1, 32>}, {pipeline_mode = #tpu.pipeline_mode<synchronous>, transform_indices = @transform_13, window_bounds = array<i64: 1, 32>}, {pipeline_mode = #tpu.pipeline_mode<synchronous>, transform_indices = @transform_14, window_bounds = array<i64: 64, 2>}, {transform_indices = @transform_15, window_bounds = array<i64: 1, 64, 32>}]} {
    %c0 = arith.constant 0 : index
    %c0_0 = arith.constant 0 : index
    %c0_1 = arith.constant 0 : index
    %0 = vector.load %arg1[%c0, %c0_0, %c0_1] : memref<1x64x32xf32, #tpu.memory_space<vmem>>, vector<1x64x32xf32>
    %1 = vector.shape_cast %0 : vector<1x64x32xf32> to vector<64x32xf32>
    %2 = arith.truncf %1 : vector<64x32xf32> to vector<64x32xbf16>
    %c0_2 = arith.constant 0 : index
    %c0_3 = arith.constant 0 : index
    %3 = vector.load %arg2[%c0_2, %c0_3] : memref<32x32xbf16, #tpu.memory_space<vmem>>, vector<32x32xbf16>
    %cst = arith.constant dense<0.000000e+00> : vector<64x32xf32>
    %4 = tpu.matmul %2, %3, %cst {dimension_numbers = #tpu.dot_dimension_numbers<[1], [0], [0], [1], [0, 0, 1, 1], [], []>} : vector<64x32xbf16>, vector<32x32xbf16>, vector<64x32xf32> -> vector<64x32xf32>
    %cst_4 = arith.constant dense<0xFF800000> : vector<32xf32>
    %5 = vector.multi_reduction <maximumf>, %1, %cst_4 [0] : vector<64x32xf32> to vector<32xf32>
    %6 = vector.shape_cast %5 : vector<32xf32> to vector<1x32xf32>
    %7 = vector.broadcast %6 : vector<1x32xf32> to vector<64x32xf32>
    %8 = arith.subf %1, %7 : vector<64x32xf32>
    %9 = math.exp %8 : vector<64x32xf32>
    %cst_5 = arith.constant dense<0.000000e+00> : vector<32xf32>
    %10 = vector.multi_reduction <add>, %9, %cst_5 [0] : vector<64x32xf32> to vector<32xf32>
    %11 = vector.shape_cast %10 : vector<32xf32> to vector<1x32xf32>
    %12 = tpu.reciprocal %11 {approx = true} : vector<1x32xf32> -> vector<1x32xf32>
    %13 = vector.broadcast %12 : vector<1x32xf32> to vector<64x32xf32>
    %14 = arith.mulf %9, %13 : vector<64x32xf32>
    %c0_6 = arith.constant 0 : index
    %c0_7 = arith.constant 0 : index
    %15 = vector.load %arg3[%c0_6, %c0_7] : memref<32x8xf32, #tpu.memory_space<vmem>>, vector<32x8xf32>
    %cst_8 = arith.constant dense<0.000000e+00> : vector<64x8xf32>
    %16 = tpu.matmul %14, %15, %cst_8 {dimension_numbers = #tpu.dot_dimension_numbers<[1], [0], [0], [1], [0, 0, 1, 1], [], []>} : vector<64x32xf32>, vector<32x8xf32>, vector<64x8xf32> -> vector<64x8xf32>
    %c0_9 = arith.constant 0 : index
    %c0_10 = arith.constant 0 : index
    %17 = vector.load %arg4[%c0_9, %c0_10] : memref<8x32xf32, #tpu.memory_space<vmem>>, vector<8x32xf32>
    %cst_11 = arith.constant dense<0.000000e+00> : vector<64x32xf32>
    %18 = tpu.matmul %16, %17, %cst_11 {dimension_numbers = #tpu.dot_dimension_numbers<[1], [0], [0], [1], [0, 0, 1, 1], [], []>} : vector<64x8xf32>, vector<8x32xf32>, vector<64x32xf32> -> vector<64x32xf32>
    %cst_12 = arith.constant dense<0xFF800000> : vector<32xf32>
    %19 = vector.multi_reduction <maximumf>, %4, %cst_12 [0] : vector<64x32xf32> to vector<32xf32>
    %20 = vector.shape_cast %19 : vector<32xf32> to vector<1x32xf32>
    %21 = vector.broadcast %20 : vector<1x32xf32> to vector<64x32xf32>
    %22 = arith.subf %4, %21 : vector<64x32xf32>
    %23 = math.exp %22 : vector<64x32xf32>
    %24 = arith.mulf %23, %18 : vector<64x32xf32>
    %cst_13 = arith.constant dense<0.000000e+00> : vector<32xf32>
    %25 = vector.multi_reduction <add>, %24, %cst_13 [0] : vector<64x32xf32> to vector<32xf32>
    %26 = vector.shape_cast %25 : vector<32xf32> to vector<1x32xf32>
    %cst_14 = arith.constant dense<0.000000e+00> : vector<32xf32>
    %27 = vector.multi_reduction <add>, %23, %cst_14 [0] : vector<64x32xf32> to vector<32xf32>
    %28 = vector.shape_cast %27 : vector<32xf32> to vector<1x32xf32>
    %29 = tpu.reciprocal %28 {approx = true} : vector<1x32xf32> -> vector<1x32xf32>
    %30 = arith.mulf %26, %29 : vector<1x32xf32>
    %31 = arith.negf %30 : vector<1x32xf32>
    %32 = math.exp %31 : vector<1x32xf32>
    %cst_15 = arith.constant 1.000000e+00 : f32
    %33 = vector.broadcast %cst_15 : f32 to vector<1x32xf32>
    %34 = arith.addf %33, %32 : vector<1x32xf32>
    %35 = arith.divf %33, %34 : vector<1x32xf32>
    %c0_16 = arith.constant 0 : index
    %c0_17 = arith.constant 0 : index
    %36 = vector.load %arg14[%c0_16, %c0_17] : memref<1x32xf32, #tpu.memory_space<vmem>>, vector<1x32xf32>
    %37 = arith.mulf %35, %36 : vector<1x32xf32>
    %c0_18 = arith.constant 0 : index
    %c0_19 = arith.constant 0 : index
    %38 = vector.load %arg5[%c0_18, %c0_19] : memref<32x64xbf16, #tpu.memory_space<vmem>>, vector<32x64xbf16>
    %cst_20 = arith.constant dense<0.000000e+00> : vector<64x64xf32>
    %39 = tpu.matmul %2, %38, %cst_20 {dimension_numbers = #tpu.dot_dimension_numbers<[1], [0], [0], [1], [0, 0, 1, 1], [], []>} : vector<64x32xbf16>, vector<32x64xbf16>, vector<64x64xf32> -> vector<64x64xf32>
    %c0_21 = arith.constant 0 : index
    %c0_22 = arith.constant 0 : index
    %40 = vector.load %arg6[%c0_21, %c0_22] : memref<1x64xf32, #tpu.memory_space<vmem>>, vector<1x64xf32>
    %41 = vector.broadcast %40 : vector<1x64xf32> to vector<64x64xf32>
    %42 = arith.addf %39, %41 : vector<64x64xf32>
    %cst_23 = arith.constant 0.000000e+00 : f32
    %43 = vector.broadcast %cst_23 : f32 to vector<16x64xf32>
    %c0_24 = arith.constant 0 : index
    %c0_25 = arith.constant 0 : index
    %44 = vector.load %arg17[%c0_24, %c0_25] : memref<96x64xf32, #tpu.memory_space<vmem>>, vector<16x64xf32>
    tpu.vector_store %arg17[%c0_24, %c0_25], %43 {strides = array<i32>} : memref<96x64xf32, #tpu.memory_space<vmem>>, vector<16x64xf32>,
    %cst_26 = arith.constant 0.000000e+00 : f32
    %45 = vector.broadcast %cst_26 : f32 to vector<16x64xf32>
    %c80 = arith.constant 80 : index
    %c0_27 = arith.constant 0 : index
    %46 = vector.load %arg17[%c80, %c0_27] : memref<96x64xf32, #tpu.memory_space<vmem>>, vector<16x64xf32>
    tpu.vector_store %arg17[%c80, %c0_27], %45 {strides = array<i32>} : memref<96x64xf32, #tpu.memory_space<vmem>>, vector<16x64xf32>,
    %c16 = arith.constant 16 : index
    %c0_28 = arith.constant 0 : index
    %47 = vector.load %arg17[%c16, %c0_28] : memref<96x64xf32, #tpu.memory_space<vmem>>, vector<64x64xf32>
    tpu.vector_store %arg17[%c16, %c0_28], %42 {strides = array<i32>} : memref<96x64xf32, #tpu.memory_space<vmem>>, vector<64x64xf32>,
    %c0_29 = arith.constant 0 : index
    %c0_30 = arith.constant 0 : index
    %48 = vector.load %arg7[%c0_29, %c0_30] : memref<9x64xf32, #tpu.memory_space<vmem>>, vector<9x64xf32>
    %c0_31 = arith.constant 0 : index
    %c0_32 = arith.constant 0 : index
    %49 = vector.load %arg15[%c0_31, %c0_32] : memref<64x2xf32, #tpu.memory_space<vmem>>, vector<64x1xf32>
    %c0_33 = arith.constant 0 : index
    %c1 = arith.constant 1 : index
    %50 = vector.load %arg15[%c0_33, %c1] : memref<64x2xf32, #tpu.memory_space<vmem>>, vector<64x1xf32>
    %51 = vector.extract_strided_slice %48 {offsets = [1, 0], sizes = [1, 64], strides = [1, 1]} : vector<9x64xf32> to vector<1x64xf32>
    %c8 = arith.constant 8 : index
    %c0_34 = arith.constant 0 : index
    %52 = vector.load %arg17[%c8, %c0_34] : memref<96x64xf32, #tpu.memory_space<vmem>>, vector<64x64xf32>
    %53 = vector.broadcast %51 : vector<1x64xf32> to vector<64x64xf32>
    %54 = arith.mulf %53, %52 : vector<64x64xf32>
    %55 = vector.extract_strided_slice %48 {offsets = [4, 0], sizes = [1, 64], strides = [1, 1]} : vector<9x64xf32> to vector<1x64xf32>
    %c16_35 = arith.constant 16 : index
    %c0_36 = arith.constant 0 : index
    %56 = vector.load %arg17[%c16_35, %c0_36] : memref<96x64xf32, #tpu.memory_space<vmem>>, vector<64x64xf32>
    %57 = vector.broadcast %55 : vector<1x64xf32> to vector<64x64xf32>
    %58 = arith.mulf %57, %56 : vector<64x64xf32>
    %59 = arith.addf %54, %58 : vector<64x64xf32>
    %60 = vector.extract_strided_slice %48 {offsets = [7, 0], sizes = [1, 64], strides = [1, 1]} : vector<9x64xf32> to vector<1x64xf32>
    %c24 = arith.constant 24 : index
    %c0_37 = arith.constant 0 : index
    %61 = vector.load %arg17[%c24, %c0_37] : memref<96x64xf32, #tpu.memory_space<vmem>>, vector<64x64xf32>
    %62 = vector.broadcast %60 : vector<1x64xf32> to vector<64x64xf32>
    %63 = arith.mulf %62, %61 : vector<64x64xf32>
    %64 = arith.addf %59, %63 : vector<64x64xf32>
    %65 = vector.extract_strided_slice %48 {offsets = [0, 0], sizes = [1, 64], strides = [1, 1]} : vector<9x64xf32> to vector<1x64xf32>
    %c7 = arith.constant 7 : index
    %c0_38 = arith.constant 0 : index
    %66 = vector.load %arg17[%c7, %c0_38] : memref<96x64xf32, #tpu.memory_space<vmem>>, vector<64x64xf32>
    %67 = vector.broadcast %65 : vector<1x64xf32> to vector<64x64xf32>
    %68 = arith.mulf %67, %66 : vector<64x64xf32>
    %69 = vector.extract_strided_slice %48 {offsets = [3, 0], sizes = [1, 64], strides = [1, 1]} : vector<9x64xf32> to vector<1x64xf32>
    %c15 = arith.constant 15 : index
    %c0_39 = arith.constant 0 : index
    %70 = vector.load %arg17[%c15, %c0_39] : memref<96x64xf32, #tpu.memory_space<vmem>>, vector<64x64xf32>
    %71 = vector.broadcast %69 : vector<1x64xf32> to vector<64x64xf32>
    %72 = arith.mulf %71, %70 : vector<64x64xf32>
    %73 = arith.addf %68, %72 : vector<64x64xf32>
    %74 = vector.extract_strided_slice %48 {offsets = [6, 0], sizes = [1, 64], strides = [1, 1]} : vector<9x64xf32> to vector<1x64xf32>
    %c23 = arith.constant 23 : index
    %c0_40 = arith.constant 0 : index
    %75 = vector.load %arg17[%c23, %c0_40] : memref<96x64xf32, #tpu.memory_space<vmem>>, vector<64x64xf32>
    %76 = vector.broadcast %74 : vector<1x64xf32> to vector<64x64xf32>
    %77 = arith.mulf %76, %75 : vector<64x64xf32>
    %78 = arith.addf %73, %77 : vector<64x64xf32>
    %79 = vector.extract_strided_slice %48 {offsets = [2, 0], sizes = [1, 64], strides = [1, 1]} : vector<9x64xf32> to vector<1x64xf32>
    %c9 = arith.constant 9 : index
    %c0_41 = arith.constant 0 : index
    %80 = vector.load %arg17[%c9, %c0_41] : memref<96x64xf32, #tpu.memory_space<vmem>>, vector<64x64xf32>
    %81 = vector.broadcast %79 : vector<1x64xf32> to vector<64x64xf32>
    %82 = arith.mulf %81, %80 : vector<64x64xf32>
    %83 = vector.extract_strided_slice %48 {offsets = [5, 0], sizes = [1, 64], strides = [1, 1]} : vector<9x64xf32> to vector<1x64xf32>
    %c17 = arith.constant 17 : index
    %c0_42 = arith.constant 0 : index
    %84 = vector.load %arg17[%c17, %c0_42] : memref<96x64xf32, #tpu.memory_space<vmem>>, vector<64x64xf32>
    %85 = vector.broadcast %83 : vector<1x64xf32> to vector<64x64xf32>
    %86 = arith.mulf %85, %84 : vector<64x64xf32>
    %87 = arith.addf %82, %86 : vector<64x64xf32>
    %88 = vector.extract_strided_slice %48 {offsets = [8, 0], sizes = [1, 64], strides = [1, 1]} : vector<9x64xf32> to vector<1x64xf32>
    %c25 = arith.constant 25 : index
    %c0_43 = arith.constant 0 : index
    %89 = vector.load %arg17[%c25, %c0_43] : memref<96x64xf32, #tpu.memory_space<vmem>>, vector<64x64xf32>
    %90 = vector.broadcast %88 : vector<1x64xf32> to vector<64x64xf32>
    %91 = arith.mulf %90, %89 : vector<64x64xf32>
    %92 = arith.addf %87, %91 : vector<64x64xf32>
    %93 = vector.broadcast %49 : vector<64x1xf32> to vector<64x64xf32>
    %94 = arith.mulf %93, %78 : vector<64x64xf32>
    %95 = arith.addf %64, %94 : vector<64x64xf32>
    %96 = vector.broadcast %50 : vector<64x1xf32> to vector<64x64xf32>
    %97 = arith.mulf %96, %92 : vector<64x64xf32>
    %98 = arith.addf %95, %97 : vector<64x64xf32>
    %c0_44 = arith.constant 0 : index
    %c0_45 = arith.constant 0 : index
    %99 = vector.load %arg8[%c0_44, %c0_45] : memref<1x64xf32, #tpu.memory_space<vmem>>, vector<1x64xf32>
    %100 = vector.broadcast %99 : vector<1x64xf32> to vector<64x64xf32>
    %101 = arith.addf %98, %100 : vector<64x64xf32>
    %c0_46 = arith.constant 0 : index
    %c0_47 = arith.constant 0 : index
    %102 = vector.load %arg9[%c0_46, %c0_47] : memref<1x64xf32, #tpu.memory_space<vmem>>, vector<1x64xf32>
    %103 = arith.mulf %101, %101 : vector<64x64xf32>
    %104 = arith.mulf %101, %103 : vector<64x64xf32>
    %cst_48 = arith.constant 4.471500e-02 : f32
    %105 = vector.broadcast %cst_48 : f32 to vector<64x64xf32>
    %106 = arith.mulf %105, %104 : vector<64x64xf32>
    %107 = arith.addf %101, %106 : vector<64x64xf32>
    %cst_49 = arith.constant 0.797884583 : f32
    %108 = vector.broadcast %cst_49 : f32 to vector<64x64xf32>
    %109 = arith.mulf %108, %107 : vector<64x64xf32>
    %110 = math.tanh %109 : vector<64x64xf32>
    %cst_50 = arith.constant 1.000000e+00 : f32
    %111 = vector.broadcast %cst_50 : f32 to vector<64x64xf32>
    %112 = arith.addf %111, %110 : vector<64x64xf32>
    %cst_51 = arith.constant 5.000000e-01 : f32
    %113 = vector.broadcast %cst_51 : f32 to vector<64x64xf32>
    %114 = arith.mulf %113, %112 : vector<64x64xf32>
    %115 = arith.mulf %101, %114 : vector<64x64xf32>
    %116 = vector.broadcast %102 : vector<1x64xf32> to vector<64x64xf32>
    %117 = arith.mulf %116, %115 : vector<64x64xf32>
    %118 = arith.truncf %117 : vector<64x64xf32> to vector<64x64xbf16>
    %c0_52 = arith.constant 0 : index
    %c0_53 = arith.constant 0 : index
    %119 = vector.load %arg10[%c0_52, %c0_53] : memref<64x32xbf16, #tpu.memory_space<vmem>>, vector<64x32xbf16>
    %cst_54 = arith.constant dense<0.000000e+00> : vector<64x32xf32>
    %120 = tpu.matmul %118, %119, %cst_54 {dimension_numbers = #tpu.dot_dimension_numbers<[1], [0], [0], [1], [0, 0, 1, 1], [], []>} : vector<64x64xbf16>, vector<64x32xbf16>, vector<64x32xf32> -> vector<64x32xf32>
    %c0_55 = arith.constant 0 : index
    %c0_56 = arith.constant 0 : index
    %121 = vector.load %arg11[%c0_55, %c0_56] : memref<1x32xf32, #tpu.memory_space<vmem>>, vector<1x32xf32>
    %122 = vector.broadcast %121 : vector<1x32xf32> to vector<64x32xf32>
    %123 = arith.addf %120, %122 : vector<64x32xf32>
    %cst_57 = arith.constant dense<0.000000e+00> : vector<64xf32>
    %124 = vector.multi_reduction <add>, %123, %cst_57 [1] : vector<64x32xf32> to vector<64xf32>
    %125 = vector.shape_cast %124 : vector<64xf32> to vector<64x1xf32>
    %cst_58 = arith.constant 3.200000e+01 : f32
    %126 = vector.broadcast %cst_58 : f32 to vector<64x1xf32>
    %127 = arith.divf %125, %126 : vector<64x1xf32>
    %128 = vector.broadcast %127 : vector<64x1xf32> to vector<64x32xf32>
    %129 = arith.subf %123, %128 : vector<64x32xf32>
    %130 = arith.mulf %129, %129 : vector<64x32xf32>
    %cst_59 = arith.constant dense<0.000000e+00> : vector<64xf32>
    %131 = vector.multi_reduction <add>, %130, %cst_59 [1] : vector<64x32xf32> to vector<64xf32>
    %132 = vector.shape_cast %131 : vector<64xf32> to vector<64x1xf32>
    %cst_60 = arith.constant 3.200000e+01 : f32
    %133 = vector.broadcast %cst_60 : f32 to vector<64x1xf32>
    %134 = arith.divf %132, %133 : vector<64x1xf32>
    %135 = vector.broadcast %127 : vector<64x1xf32> to vector<64x32xf32>
    %136 = arith.subf %123, %135 : vector<64x32xf32>
    %cst_61 = arith.constant 9.99999974E-6 : f32
    %137 = vector.broadcast %cst_61 : f32 to vector<64x1xf32>
    %138 = arith.addf %134, %137 : vector<64x1xf32>
    %139 = math.rsqrt %138 : vector<64x1xf32>
    %140 = vector.broadcast %139 : vector<64x1xf32> to vector<64x32xf32>
    %141 = arith.mulf %136, %140 : vector<64x32xf32>
    %c0_62 = arith.constant 0 : index
    %c0_63 = arith.constant 0 : index
    %142 = vector.load %arg12[%c0_62, %c0_63] : memref<1x32xf32, #tpu.memory_space<vmem>>, vector<1x32xf32>
    %143 = vector.broadcast %142 : vector<1x32xf32> to vector<64x32xf32>
    %144 = arith.mulf %141, %143 : vector<64x32xf32>
    %c0_64 = arith.constant 0 : index
    %c0_65 = arith.constant 0 : index
    %145 = vector.load %arg13[%c0_64, %c0_65] : memref<1x32xf32, #tpu.memory_space<vmem>>, vector<1x32xf32>
    %146 = vector.broadcast %145 : vector<1x32xf32> to vector<64x32xf32>
    %147 = arith.addf %144, %146 : vector<64x32xf32>
    %148 = vector.broadcast %37 : vector<1x32xf32> to vector<64x32xf32>
    %149 = arith.mulf %147, %148 : vector<64x32xf32>
    %c0_66 = arith.constant 0 : index
    %c0_67 = arith.constant 0 : index
    %c0_68 = arith.constant 0 : index
    %150 = vector.load %arg16[%c0_66, %c0_67, %c0_68] : memref<1x64x32xf32, #tpu.memory_space<vmem>>, vector<1x64x32xf32>
    %151 = vector.shape_cast %150 : vector<1x64x32xf32> to vector<64x32xf32>
    %152 = vector.shape_cast %149 : vector<64x32xf32> to vector<1x64x32xf32>
    tpu.vector_store %arg16[%c0_66, %c0_67, %c0_68], %152 {strides = array<i32>} : memref<1x64x32xf32, #tpu.memory_space<vmem>>, vector<1x64x32xf32>,
    return
  }
  func.func @transform_0(%arg0: i32) -> (i32, i32, i32) {
    %c0_i32 = arith.constant 0 : i32
    %c0_i32_0 = arith.constant 0 : i32
    %c0_i32_1 = arith.constant 0 : i32
    return %arg0, %c0_i32, %c0_i32_0 : i32, i32, i32
  }
  func.func @transform_1(%arg0: i32) -> (i32, i32) {
    %c0_i32 = arith.constant 0 : i32
    %c0_i32_0 = arith.constant 0 : i32
    %c0_i32_1 = arith.constant 0 : i32
    return %c0_i32, %c0_i32_0 : i32, i32
  }
  func.func @transform_2(%arg0: i32) -> (i32, i32) {
    %c0_i32 = arith.constant 0 : i32
    %c0_i32_0 = arith.constant 0 : i32
    %c0_i32_1 = arith.constant 0 : i32
    return %c0_i32, %c0_i32_0 : i32, i32
  }
  func.func @transform_3(%arg0: i32) -> (i32, i32) {
    %c0_i32 = arith.constant 0 : i32
    %c0_i32_0 = arith.constant 0 : i32
    %c0_i32_1 = arith.constant 0 : i32
    return %c0_i32, %c0_i32_0 : i32, i32
  }
  func.func @transform_4(%arg0: i32) -> (i32, i32) {
    %c0_i32 = arith.constant 0 : i32
    %c0_i32_0 = arith.constant 0 : i32
    %c0_i32_1 = arith.constant 0 : i32
    return %c0_i32, %c0_i32_0 : i32, i32
  }
  func.func @transform_5(%arg0: i32) -> (i32, i32) {
    %c0_i32 = arith.constant 0 : i32
    %c0_i32_0 = arith.constant 0 : i32
    %c0_i32_1 = arith.constant 0 : i32
    return %c0_i32, %c0_i32_0 : i32, i32
  }
  func.func @transform_6(%arg0: i32) -> (i32, i32) {
    %c0_i32 = arith.constant 0 : i32
    %c0_i32_0 = arith.constant 0 : i32
    %c0_i32_1 = arith.constant 0 : i32
    return %c0_i32, %c0_i32_0 : i32, i32
  }
  func.func @transform_7(%arg0: i32) -> (i32, i32) {
    %c0_i32 = arith.constant 0 : i32
    %c0_i32_0 = arith.constant 0 : i32
    %c0_i32_1 = arith.constant 0 : i32
    return %c0_i32, %c0_i32_0 : i32, i32
  }
  func.func @transform_8(%arg0: i32) -> (i32, i32) {
    %c0_i32 = arith.constant 0 : i32
    %c0_i32_0 = arith.constant 0 : i32
    %c0_i32_1 = arith.constant 0 : i32
    return %c0_i32, %c0_i32_0 : i32, i32
  }
  func.func @transform_9(%arg0: i32) -> (i32, i32) {
    %c0_i32 = arith.constant 0 : i32
    %c0_i32_0 = arith.constant 0 : i32
    %c0_i32_1 = arith.constant 0 : i32
    return %c0_i32, %c0_i32_0 : i32, i32
  }
  func.func @transform_10(%arg0: i32) -> (i32, i32) {
    %c0_i32 = arith.constant 0 : i32
    %c0_i32_0 = arith.constant 0 : i32
    %c0_i32_1 = arith.constant 0 : i32
    return %c0_i32, %c0_i32_0 : i32, i32
  }
  func.func @transform_11(%arg0: i32) -> (i32, i32) {
    %c0_i32 = arith.constant 0 : i32
    %c0_i32_0 = arith.constant 0 : i32
    %c0_i32_1 = arith.constant 0 : i32
    return %c0_i32, %c0_i32_0 : i32, i32
  }
  func.func @transform_12(%arg0: i32) -> (i32, i32) {
    %c0_i32 = arith.constant 0 : i32
    %c0_i32_0 = arith.constant 0 : i32
    %c0_i32_1 = arith.constant 0 : i32
    return %c0_i32, %c0_i32_0 : i32, i32
  }
  func.func @transform_13(%arg0: i32) -> (i32, i32) {
    %c0_i32 = arith.constant 0 : i32
    %c0_i32_0 = arith.constant 0 : i32
    %c0_i32_1 = arith.constant 0 : i32
    return %c0_i32, %c0_i32_0 : i32, i32
  }
  func.func @transform_14(%arg0: i32) -> (i32, i32) {
    %c0_i32 = arith.constant 0 : i32
    %c0_i32_0 = arith.constant 0 : i32
    %c0_i32_1 = arith.constant 0 : i32
    return %c0_i32, %c0_i32_0 : i32, i32
  }
  func.func @transform_15(%arg0: i32) -> (i32, i32, i32) {
    %c0_i32 = arith.constant 0 : i32
    %c0_i32_0 = arith.constant 0 : i32
    %c0_i32_1 = arith.constant 0 : i32
    return %arg0, %c0_i32, %c0_i32_0 : i32, i32, i32
  }
}

</mosaic_0001>

<bundles_post_ra>
// kernel: tpu_custom_call.1
= control target key start
LH: loop header
LB: loop body
LE: loop exit
PB: predicated region body
PF: predicated region fallthrough
CT: control target
= control target key end

     0   :  { %s2251_s18 = smov 0   ;;  %s2857_s0 = inlined_call_operand.vmem [shape: f32[2,64,32], index: 0, kind: input, shape index: {}]   ;;  %s2858_s1 = inlined_call_operand.vmem [shape: bf16[32,32], index: 1, kind: input, shape index: {}]   ;;  %s2859_s2 = inlined_call_operand.vmem [shape: f32[32,8], index: 2, kind: input, shape index: {}]   ;;  %s2860_s3 = inlined_call_operand.vmem [shape: f32[8,32], index: 3, kind: input, shape index: {}]   ;;  %s2861_s4 = inlined_call_operand.vmem [shape: bf16[32,64], index: 4, kind: input, shape index: {}]   ;;  %s2862_s5 = inlined_call_operand.vmem [shape: f32[1,64], index: 5, kind: input, shape index: {}]   ;;  %s2863_s6 = inlined_call_operand.vmem [shape: f32[9,64], index: 6, kind: input, shape index: {}]   ;;  %s2864_s7 = inlined_call_operand.vmem [shape: f32[1,64], index: 7, kind: input, shape index: {}]   ;;  %s2865_s8 = inlined_call_operand.vmem [shape: f32[1,64], index: 8, kind: input, shape index: {}]   ;;  %s2866_s9 = inlined_call_operand.vmem [shape: bf16[64,32], index: 9, kind: input, shape index: {}]   ;;  %s2867_s10 = inlined_call_operand.vmem [shape: f32[1,32], index: 10, kind: input, shape index: {}]   ;;  %s2868_s11 = inlined_call_operand.vmem [shape: f32[1,32], index: 11, kind: input, shape index: {}]   ;;  %s2869_s12 = inlined_call_operand.vmem [shape: f32[1,32], index: 12, kind: input, shape index: {}]   ;;  %s2870_s13 = inlined_call_operand.vmem [shape: f32[1,32], index: 13, kind: input, shape index: {}]   ;;  %s2871_s14 = inlined_call_operand.vmem [shape: f32[64,2], index: 14, kind: input, shape index: {}]   ;;  %s2872_s15 = inlined_call_operand.vmem [shape: f32[2,64,32], index: 15, kind: output, shape index: {}]  }
   0x1 LB: > { %s1879_s19 = sadd.s32 4294967295, %s2166_s18   ;;  %p1883_p0 = scmp.ge.s32.totalorder %s2166_s18, 1  ;;  %s2166_s18 = sphi %s2251_s18, %s25_s18  }
   0x2   : > { %p437_p1 = scmp.lt.s32.totalorder %s2166_s18, 3 }
   0x4   : > { %p438_p2 = pnand %p1883_p0, %p437_p1 }
   0x6   : > { %441 = sbr.rel (%p438_p2) target bundleno = 956 (0x3bc), region = 80 }
   0xd   : > { %v2080_v0 = vld [vmem:[%s2858_s1] sm:$0xff]   ;;  %p485_p3 = scmp.lt.s32.totalorder %s1879_s19, 1  ;;  %v2081_v1 = vld [vmem:[%s2858_s1 + $0x8] sm:$0xff]   ;;  %v679_v4 = vld [vmem:[%s2859_s2 + $0x10] sm:$0xff]  ;;  %vm524_vm0 = vcmask 261120   ;;  %v2168_v7 = vmov 0  }
   0xe   : > { %1977 = vmatprep.subr.bf16.mxu0 %v2080_v0  ;;  %2059 = vmatprep.subr.bf16.mxu1 %v2080_v0  ;;  %v677_v2 = vld [vmem:[%s2859_s2] sm:$0xff]  ;;  %v678_v3 = vld [vmem:[%s2859_s2 + $0x8] sm:$0xff]  ;;  %v680_v5 = vld [vmem:[%s2859_s2 + $0x18] sm:$0xff]  ;;  %v2169_v42 = vmov 1   ;;  %vm1134_vm1 = vcmask 523264   ;;  %vm811_vm2 = vcmask 64512  }
   0xf   : > { %s2888_s19 = smov (!%p485_p3, %s1879_s19), 1  ;;  %1978 = vmatpush3.bf16.msra.mxu0 %v2080_v0  ;;  %2061 = vmatpush3.bf16.msra.mxu1 %v2080_v0  ;;  %v2051_v6 = vpack.c.bf16 %v678_v3, %v677_v2  ;;  %v1151_v8 = vld [vmem:[%s2871_s14 + $0x10] sm:$0xff]  ;;  %v2055_v12 = vpack.c.bf16 %v680_v5, %v679_v4  ;;  %v1152_v13 = vld [vmem:[%s2871_s14 + $0x18] sm:$0xff]  ;;  %v1149_v27 = vld [vmem:[%s2871_s14] sm:$0xff] }
  0x10   : > { %1979 = vmatprep.subr.bf16.mxu0 %v2081_v1  ;;  %2060 = vmatprep.subr.bf16.mxu1 %v2081_v1  ;;  %s1934_s17 = sshll.u32 %s2888_s19, 6  ;;  %v1150_v36 = vld [vmem:[%s2871_s14 + $0x8] sm:$0xff]  ;;  %v2354_v40 = vld [vmem:[%s2861_s4] sm:$0xff]   ;;  %v1155_v50 = vld [vmem:[%s2871_s14 + $0x30] sm:$0xff] }
  0x11   : > { %s489_s22 = scalar_lea.vmem %s2857_s0, %s1934_s17  ;;  %2075 = vset.pattern.permute.xlu1 %v2168_v7  ;;  %2074 = vset.pattern.permute.xlu0 %v2168_v7  ;;  %v1154_v41 = vld [vmem:[%s2871_s14 + $0x28] sm:$0xff]  ;;  %v1153_v47 = vld [vmem:[%s2871_s14 + $0x20] sm:$0xff]  ;;  %v1156_v55 = vld [vmem:[%s2871_s14 + $0x38] sm:$0xff]  ;;  %s2830_s25 = scalar_lea.vmem %s2872_s15, %s1934_s17 }
  0x12   : > { %v2290_v9 = vld [vmem:[%s489_s22] sm:$0xff]  ;;  %v2292_v10 = vld [vmem:[%s489_s22 + $0x8] sm:$0xff]  ;;  %v2294_v11 = vld [vmem:[%s489_s22 + $0x10] sm:$0xff]  ;;  %1355 = vperm.xlu1 %2075, %v1151_v8   ;;  %1345 = vperm.xlu0 %2074, %v1149_v27  }
  0x13   : > { %1980 = vmatpush3.bf16.msra.mxu0 %v2081_v1  ;;  %2062 = vmatpush3.bf16.msra.mxu1 %v2081_v1  ;;  %v2301_v14 = vpack.c.bf16 %v2292_v10, %v2290_v9  ;;  %v602_v15 = vsel %vm524_vm0, %v2290_v9, -inf  ;;  %v603_v16 = vsel %vm524_vm0, %v2292_v10, -inf  ;;  %v2307_v17 = vld [vmem:[%s489_s22 + $0x18] sm:$0xff]  ;;  %v500_v18 = vld [vmem:[%s489_s22 + $0x20] sm:$0xff]  ;;  %v2309_v19 = vld [vmem:[%s489_s22 + $0x28] sm:$0xff]  ;;  %v604_v20 = vsel %vm524_vm0, %v2294_v11, -inf }
  0x14   : > { %v2313_v21 = vld [vmem:[%s489_s22 + $0x30] sm:$0xff]  ;;  %v2315_v22 = vld [vmem:[%s489_s22 + $0x38] sm:$0xff]  ;;  %v2318_v23 = vpack.c.bf16 %v2309_v19, %v500_v18  ;;  %v605_v24 = vsel %vm524_vm0, %v2307_v17, -inf  ;;  %v606_v25 = vsel %vm524_vm0, %v500_v18, -inf  ;;  %v608_v26 = vsel %vm524_vm0, %v2309_v19, -inf  ;;  %2052 = vmatprep.subr.bf16.mxu1 %v2051_v6 }
  0x15   : > { %1981 = vmatprep.mubr.msk.bf16.mxu0 %vm524_vm0, %v2301_v14  ;;  %v607_v28 = vmax.f32 %v602_v15, %v606_v25  ;;  %v609_v29 = vmax.f32 %v603_v16, %v608_v26  ;;  %v610_v30 = vsel %vm524_vm0, %v2313_v21, -inf  ;;  %v612_v31 = vsel %vm524_vm0, %v2315_v22, -inf }
  0x16   : > { %1985 = vmatprep.mubr.msk.bf16.mxu1 %vm524_vm0, %v2318_v23  ;;  %v611_v32 = vmax.f32 %v604_v20, %v610_v30  ;;  %v613_v33 = vmax.f32 %v605_v24, %v612_v31  ;;  %v2338_v34 = vpack.c.bf16 %v2307_v17, %v2294_v11  ;;  %v2342_v35 = vpack.c.bf16 %v2315_v22, %v2313_v21 }
  0x17   : > { %v614_v37 = vmax.f32 %v607_v28, %v609_v29  ;;  %1360 = vperm.xlu1 %2075, %v1152_v13   ;;  %1350 = vperm.xlu0 %2074, %v1150_v36  }
  0x18   : > { %v615_v38 = vmax.f32 %v611_v32, %v613_v33  ;;  %1982 = vmatmul.mubr.msk.bf16.vlgmr.msra.gmra.mrb[0].mxu0 %vm524_vm0, %v2338_v34  ;;  %1986 = vmatmul.mubr.msk.bf16.vlgmr.msra.gmra.mrb[0].mxu1 %vm524_vm0, %v2342_v35 }
  0x19   : > { %2054 = vmatpush3.bf16.msra.mxu1 %v2051_v6 }
  0x1a   : > { %v616_v39 = vmax.f32 %v614_v37, %v615_v38  ;;  %2056 = vmatprep.subr.bf16.mxu1 %v2055_v12 }
  0x1b   : > { %2076 = vset.pattern.permute.xlu1 %v2169_v42  ;;  %1370 = vperm.xlu0 %2074, %v1154_v41  }
  0x1c   : > { %v617_v43 = vrot.slane %v616_v39, 4  ;;  %1404 = vperm.xlu1 %2076, %v1150_v36  }
  0x1d   : > { %2058 = vmatpush3.bf16.msra.mxu1 %v2055_v12 }
  0x1e   : > { %v618_v44 = vmax.f32 %v616_v39, %v617_v43  ;;  %2023 = vmatprep.subr.bf16.mxu1 %v2354_v40 }
  0x1f   : > { %2078 = vset.pattern.permute.xlu0 %v2169_v42 }
  0x20   : > { %v619_v45 = vrot.slane %v618_v44, 2  ;;  %1408 = vperm.xlu1 %2076, %v1151_v8   ;;  %1400 = vperm.xlu0 %2078, %v1149_v27  }
  0x22   : > { %v620_v46 = vmax.f32 %v618_v44, %v619_v45 }
  0x24   : > { %v621_v48 = vrot.slane %v620_v46, 1  ;;  %2077 = vset.pattern.permute.xlu1 %v2168_v7  ;;  %1412 = vperm.xlu0 %2078, %v1152_v13  }
  0x25   : > { %1365 = vperm.xlu1 %2077, %v1153_v47  }
  0x26   : > { %v622_v49 = vmax.f32 %v620_v46, %v621_v48  ;;  %v2170_v48 = vmov 0.0  }
  0x27   : > { %1135 = vst.msk [vmem:[#allocation2] sm:$0xff] %vm1134_vm1, %v2170_v48  ;;  %1136 = vst.msk [vmem:[#allocation2 + $0x8] sm:$0xff] %vm1134_vm1, %v2170_v48 }
  0x28   : > { %v627_v51 = vsub.f32 %v500_v18, %v622_v49  ;;  %v623_v52 = vsub.f32 %v2290_v9, %v622_v49  ;;  %v624_v53 = vsub.f32 %v2292_v10, %v622_v49  ;;  %v625_v54 = vsub.f32 %v2294_v11, %v622_v49  ;;  %1416 = vperm.xlu0 %2078, %v1153_v47  }
  0x29   : > { %1375 = vperm.xlu1 %2077, %v1155_v50   ;;  %v626_v57 = vsub.f32 %v2307_v17, %v622_v49  ;;  %v628_v59 = vsub.f32 %v2309_v19, %v622_v49  ;;  %v629_v62 = vsub.f32 %v2313_v21, %v622_v49  ;;  %v630_v0 = vsub.f32 %v2315_v22, %v622_v49 }
  0x2a   : > { %v639_v56 = vmul.f32 1.442695, %v627_v51  ;;  %v631_v58 = vmul.f32 1.442695, %v623_v52  ;;  %v633_v60 = vmul.f32 1.442695, %v624_v53 }
  0x2b   : > { %v635_v61 = vmul.f32 1.442695, %v625_v54  ;;  %v637_v63 = vmul.f32 1.442695, %v626_v57  ;;  %v641_v1 = vmul.f32 1.442695, %v628_v59 }
  0x2c   : > { %1428 = vperm.xlu0 %2078, %v1156_v55   ;;  %2088 = vpow2.f32 %v639_v56  ;;  %v643_v2 = vmul.f32 1.442695, %v629_v62  ;;  %v645_v3 = vmul.f32 1.442695, %v630_v0  ;;  %1137 = vst.msk [vmem:[#allocation2 + $0x50] sm:$0xff] %vm1134_vm1, %v2170_v48  ;;  %1138 = vst.msk [vmem:[#allocation2 + $0x58] sm:$0xff] %vm1134_vm1, %v2170_v48 }
  0x2d   : > { %1380 = vperm.xlu1 %2077, %v1156_v55   ;;  %2090 = vpow2.f32 %v631_v58 }
  0x2e   : > { %2092 = vpow2.f32 %v633_v60 }
  0x2f   : > { %2094 = vpow2.f32 %v635_v61 }
  0x30   : > { %2096 = vpow2.f32 %v637_v63 }
  0x31   : > { %2079 = vset.pattern.permute.xlu1 %v2169_v42  ;;  %2098 = vpow2.f32 %v641_v1  ;;  %v2083_v42 = vld [vmem:[%s2861_s4 + $0x8] sm:$0xff]  }
  0x32   : > { %1420 = vperm.xlu1 %2079, %v1154_v41   ;;  %2100 = vpow2.f32 %v643_v2 }
  0x33   : > { %2102 = vpow2.f32 %v645_v3 }
  0x36   : > { %1424 = vperm.xlu1 %2079, %v1155_v50   ;;  %v2089_v4 = vpop.eup %2088 }
  0x37   : > { %v2091_v5 = vpop.eup %2090  ;;  %v654_v17 = vsel %vm524_vm0, %v2089_v4, 0.0 }
  0x38   : > { %v2093_v6 = vpop.eup %2092  ;;  %v647_v7 = vsel %vm524_vm0, %v2091_v5, 0.0 }
  0x39   : > { %v2095_v8 = vpop.eup %2094  ;;  %v648_v9 = vsel %vm524_vm0, %v2093_v6, 0.0 }
  0x3a   : > { %v2097_v10 = vpop.eup %2096  ;;  %v649_v11 = vadd.f32 %v648_v9, %v647_v7  ;;  %v650_v12 = vsel %vm524_vm0, %v2095_v8, 0.0 }
  0x3b   : > { %v652_v13 = vsel %vm524_vm0, %v2097_v10, 0.0  ;;  %v2099_v15 = vpop.eup %2098 }
  0x3c   : > { %v651_v16 = vadd.f32 %v650_v12, %v649_v11  ;;  %v2101_v18 = vpop.eup %2100  ;;  %v656_v20 = vsel %vm524_vm0, %v2099_v15, 0.0 }
  0x3d   : > { %v2103_v21 = vpop.eup %2102  ;;  %v658_v24 = vsel %vm524_vm0, %v2101_v18, 0.0 }
  0x3e   : > { %v653_v19 = vadd.f32 %v652_v13, %v651_v16  ;;  %v660_v26 = vsel %vm524_vm0, %v2103_v21, 0.0 }
  0x40   : > { %v655_v22 = vadd.f32 %v654_v17, %v653_v19 }
  0x42   : > { %v657_v25 = vadd.f32 %v656_v20, %v655_v22 }
  0x44   : > { %v659_v27 = vadd.f32 %v658_v24, %v657_v25 }
  0x46   : > { %v661_v28 = vadd.f32 %v660_v26, %v659_v27 }
  0x48   : > { %v662_v29 = vrot.slane %v661_v28, 4 }
  0x4a   : > { %v663_v30 = vadd.f32 %v662_v29, %v661_v28  ;;  %v2084_v29 = vld [vmem:[%s2866_s9] sm:$0xff]  }
  0x4c   : > { %v664_v31 = vrot.slane %v663_v30, 2 }
  0x4e   : > { %v665_v32 = vadd.f32 %v664_v31, %v663_v30 }
  0x50   : > { %v666_v33 = vrot.slane %v665_v32, 1 }
  0x52   : > { %v667_v36 = vadd.f32 %v666_v33, %v665_v32 }
  0x54   : > { %2104 = vrcp.f32 %v667_v36 }
  0x5e   : > { %v2105_v37 = vpop.eup %2104 }
  0x5f   : > { %v669_v38 = vmul.f32 %v2105_v37, %v2091_v5  ;;  %v670_v39 = vmul.f32 %v2105_v37, %v2093_v6  ;;  %v671_v41 = vmul.f32 %v2105_v37, %v2095_v8  ;;  %v672_v43 = vmul.f32 %v2105_v37, %v2097_v10 }
  0x60   : > { %v673_v44 = vmul.f32 %v2105_v37, %v2089_v4  ;;  %v674_v45 = vmul.f32 %v2105_v37, %v2099_v15  ;;  %v675_v46 = vmul.f32 %v2105_v37, %v2101_v18  ;;  %v676_v47 = vmul.f32 %v2105_v37, %v2103_v21 }
  0x61   : > { %1997 = vmatprep.mubr.msk.f32.mxu1 %vm524_vm0, %v669_v38 }
  0x62   : > { %1998 = vmatmul.mubr.msk.f32.vlgmr.msra.gmra.mrb[4].mxu1 %vm524_vm0, %v670_v39 }
  0x63   : > { %2024 = vmatpush3.bf16.msra.mxu1 %v2354_v40  ;;  %2000 = vmatprep.mubr.msk.f32.mxu1 %vm524_vm0, %v671_v41  ;;  %v810_v40 = vld [vmem:[%s2860_s3] sm:$0xff] }
  0x64   : > { %2025 = vmatprep.subr.bf16.mxu1 %v2083_v42  ;;  %2009 = vmatprep.subr.mxu0 %v810_v40 }
  0x65   : > { %2010 = vmatpush3.msra.mxu0 %v810_v40 }
  0x66   : > { %2001 = vmatmul.mubr.msk.f32.gmra.mrb[6].mxu1 %vm524_vm0, %v672_v43  ;;  %2035 = vmatprep.subr.bf16.mxu0 %v2084_v29 }
  0x67   : > { %2003 = vmatprep.mubr.msk.f32.mxu1 %vm524_vm0, %v673_v44  ;;  %2026 = vmatpush3.bf16.msra.mxu1 %v2083_v42 }
  0x6a   : > { %2004 = vmatmul.mubr.msk.f32.gmra.mrb[8].mxu1 %vm524_vm0, %v674_v45 }
  0x6b   : > { %2006 = vmatprep.mubr.msk.f32.mxu1 %vm524_vm0, %v675_v46 }
  0x6e   : > { %2007 = vmatmul.mubr.msk.f32.gmra.mrb[10].mxu1 %vm524_vm0, %v676_v47 }
  0x6f   : > { %2027 = vmatprep.mubr.msk.bf16.mxu1 %vm524_vm0, %v2301_v14 }
  0x72   : > { %2028 = vmatmul.mubr.msk.bf16.vlgmr.msra.gmra.mrb[12].mxu1 %vm524_vm0, %v2338_v34 }
  0x73   : > { %2031 = vmatprep.mubr.msk.bf16.mxu1 %vm524_vm0, %v2318_v23 }
  0x7a   : > { %2032 = vmatmul.mubr.msk.bf16.gmra.mrb[16].mxu1 %vm524_vm0, %v2342_v35 }
  0xeb   : > { %v1983_v14 = vpop.f32.mrb[0].mxu0  ;;  %v1987_v23 = vpop.f32.mrb[0].mxu1 }
  0xec   : > { %v943_v34 = vsel %vm524_vm0, %v1983_v14, -inf  ;;  %v949_v35 = vsel %vm524_vm0, %v1987_v23, -inf  ;;  %v571_v49 = vpop.f32.mrb[1].mxu0  ;;  %v587_v50 = vpop.f32.mrb[1].mxu1 }
  0xed   : > { %v950_v51 = vmax.f32 %v943_v34, %v949_v35  ;;  %v941_v52 = vsel %vm524_vm0, %v571_v49, -inf  ;;  %v945_v53 = vsel %vm524_vm0, %v587_v50, -inf  ;;  %v1984_v54 = vpop.f32.mrb[2].mxu0  ;;  %v1988_v55 = vpop.f32.mrb[2].mxu1 }
  0xee   : > { %v946_v56 = vmax.f32 %v941_v52, %v945_v53  ;;  %v944_v57 = vsel %vm524_vm0, %v1984_v54, -inf  ;;  %v951_v58 = vsel %vm524_vm0, %v1988_v55, -inf  ;;  %v574_v59 = vpop.f32.mrb[3].mxu0  ;;  %v590_v60 = vpop.f32.mrb[3].mxu1  ;;  %v2085_v52 = vld [vmem:[%s2866_s9 + $0x8] sm:$0xff]  }
  0xef   : > { %v952_v61 = vmax.f32 %v944_v57, %v951_v58  ;;  %v942_v62 = vsel %vm524_vm0, %v574_v59, -inf  ;;  %v947_v63 = vsel %vm524_vm0, %v590_v60, -inf  ;;  %v2087_v58 = vld [vmem:[%s2866_s9 + $0x18] sm:$0xff]  }
  0xf0   : > { %v948_v0 = vmax.f32 %v942_v62, %v947_v63  ;;  %v2476_v62 = vld [vmem:[%s2862_s5] ss:$0 sm:$0xff] }
  0xf1   : > { %v954_v1 = vmax.f32 %v950_v51, %v952_v61 }
  0xf2   : > { %v953_v2 = vmax.f32 %v946_v56, %v948_v0 }
  0xf4   : > { %v955_v3 = vmax.f32 %v953_v2, %v954_v1 }
  0xf6   : > { %v956_v4 = vrot.slane %v955_v3, 4 }
  0xf8   : > { %v957_v5 = vmax.f32 %v955_v3, %v956_v4 }
  0xfa   : > { %v958_v6 = vrot.slane %v957_v5, 2 }
  0xfc   : > { %v959_v7 = vmax.f32 %v957_v5, %v958_v6 }
  0xfe   : > { %v960_v8 = vrot.slane %v959_v7, 1 }
 0x100   : > { %v961_v9 = vmax.f32 %v959_v7, %v960_v8 }
 0x102   : > { %v967_v10 = vsub.f32 %v590_v60, %v961_v9  ;;  %v963_v11 = vsub.f32 %v574_v59, %v961_v9  ;;  %v962_v12 = vsub.f32 %v571_v49, %v961_v9  ;;  %v965_v13 = vsub.f32 %v1984_v54, %v961_v9 }
 0x103   : > { %v964_v15 = vsub.f32 %v1983_v14, %v961_v9  ;;  %v966_v16 = vsub.f32 %v587_v50, %v961_v9  ;;  %v969_v17 = vsub.f32 %v1988_v55, %v961_v9  ;;  %v968_v18 = vsub.f32 %v1987_v23, %v961_v9  ;;  %v2086_v55 = vld [vmem:[%s2866_s9 + $0x10] sm:$0xff]  }
 0x104   : > { %v972_v19 = vmul.f32 1.442695, %v963_v11  ;;  %v970_v20 = vmul.f32 1.442695, %v962_v12  ;;  %v976_v21 = vmul.f32 1.442695, %v965_v13  ;;  %v1165_v59 = vlaneseq  ;;  %v2491_v11 = vpop.permute.xlu0 %1345 }
 0x105   : > { %v974_v22 = vmul.f32 1.442695, %v964_v15  ;;  %v978_v24 = vmul.f32 1.442695, %v966_v16  ;;  %v980_v25 = vmul.f32 1.442695, %v967_v10 }
 0x106   : > { %2106 = vpow2.f32 %v972_v19  ;;  %v982_v26 = vmul.f32 1.442695, %v968_v18  ;;  %v984_v27 = vmul.f32 1.442695, %v969_v17  ;;  %v2478_v63 = vshrl.u32 %v1165_v59, 7  ;;  %v1147_v10 = vld [vmem:[%s2863_s6] sm:$0xff]  ;;  %v2499_v17 = vpop.permute.xlu1 %1355 }
 0x107   : > { %2108 = vpow2.f32 %v970_v20 }
 0x108   : > { %2110 = vpow2.f32 %v976_v21  ;;  %2881 = vst [vmem:[#allocation6_spill] sm:$0xff] %v2478_v63  ;;  %v1167_v5 = vsub.s32 1, %v2478_v63  ;;  %v2873_v6 = vsub.s32 0, %v2478_v63  ;;  %v1180_v9 = vsub.s32 4, %v2478_v63 }
 0x109   : > { %2112 = vpow2.f32 %v974_v22  ;;  %v1201_v13 = vsub.s32 7, %v2478_v63  ;;  %v1242_v15 = vsub.s32 3, %v2478_v63  ;;  %v1291_v16 = vsub.s32 2, %v2478_v63  ;;  %v1157_v22 = vld [vmem:[#allocation2 + $0x8] sm:$0xff] }
 0x10a   : > { %2114 = vpow2.f32 %v978_v24  ;;  %v1263_v18 = vsub.s32 6, %v2478_v63  ;;  %v2503_v19 = vrot.slane %v1147_v10, %v1167_v5  ;;  %v2507_v20 = vrot.slane %v1147_v10, %v2873_v6 }
 0x10b   : > { %2116 = vpow2.f32 %v980_v25  ;;  %v1304_v21 = vsub.s32 5, %v2478_v63  ;;  %v2510_v24 = vrot.slane %v1147_v10, %v1180_v9  ;;  %v1219_v25 = vld [vmem:[#allocation2 + $0x7] sm:$0xff] }
 0x10c   : > { %2118 = vpow2.f32 %v982_v26 }
 0x10d   : > { %2120 = vpow2.f32 %v984_v27  ;;  %v2512_v27 = vrot.slane %v1147_v10, %v1201_v13 }
 0x110   : > { %v2420_v28 = vpop.eup %2106 }
 0x111   : > { %v2425_v30 = vpop.eup %2108  ;;  %v1016_v31 = vsel %vm524_vm0, %v2420_v28, 0.0 }
 0x112   : > { %v2429_v32 = vpop.eup %2110  ;;  %v1015_v33 = vsel %vm524_vm0, %v2425_v30, 0.0 }
 0x113   : > { %v2433_v36 = vpop.eup %2112  ;;  %v1017_v37 = vadd.f32 %v1016_v31, %v1015_v33  ;;  %v1020_v39 = vsel %vm524_vm0, %v2429_v32, 0.0  ;;  %v2517_v33 = vrot.slane %v1147_v10, %v1291_v16 }
 0x114   : > { %v2435_v38 = vpop.eup %2114  ;;  %v1018_v41 = vsel %vm524_vm0, %v2433_v36, 0.0 }
 0x115   : > { %2878 = vst [vmem:[#allocation3_spill] sm:$0xff] %v2435_v38  ;;  %v2441_v42 = vpop.eup %2116  ;;  %v1019_v43 = vadd.f32 %v1018_v41, %v1017_v37  ;;  %v1022_v44 = vsel %vm524_vm0, %v2435_v38, 0.0  ;;  %v1169_v41 = vmul.f32 %v2503_v19, %v1157_v22 }
 0x116   : > { %v2445_v45 = vpop.eup %2118  ;;  %v1024_v47 = vsel %vm524_vm0, %v2441_v42, 0.0 }
 0x117   : > { %2879 = vst [vmem:[#allocation4_spill] sm:$0xff] %v2445_v45  ;;  %v1021_v46 = vadd.f32 %v1020_v39, %v1019_v43  ;;  %v2449_v40 = vpop.eup %2120  ;;  %v1026_v14 = vsel %vm524_vm0, %v2445_v45, 0.0  ;;  %v2519_v39 = vpop.permute.xlu0 %1350  ;;  %v1231_v43 = vmul.f32 %v2507_v20, %v1219_v25 }
 0x118   : > { %2880 = vst [vmem:[#allocation5_spill] sm:$0xff] %v2449_v40  ;;  %v1028_v34 = vsel %vm524_vm0, %v2449_v40, 0.0 }
 0x119   : > { %v1023_v48 = vadd.f32 %v1022_v44, %v1021_v46  ;;  %v2523_v44 = vrot.slane %v1147_v10, %v1263_v18 }
 0x11b   : > { %v1025_v23 = vadd.f32 %v1024_v47, %v1023_v48  ;;  %v2560_v18 = vpop.permute.xlu0 %1370 }
 0x11d   : > { %v1027_v35 = vadd.f32 %v1026_v14, %v1025_v23 }
 0x11f   : > { %v2455_v49 = vadd.f32 %v1028_v34, %v1027_v35  ;;  %v2527_v35 = vrot.slane %v1147_v10, %v1304_v21 }
 0x135   : > { %v1999_v50 = vpop.f32.mrb[4].mxu1 }
 0x136   : > { %v771_v51 = vpop.f32.mrb[5].mxu1 }
 0x137   : > { %2011 = vmatprep.mubr.msk.f32.mxu0 %vm811_vm2, %v771_v51 }
 0x138   : > { %2012 = vmatmul.mubr.msk.f32.vlgmr.msra.gmra.mrb[4].mxu0 %vm811_vm2, %v1999_v50 }
 0x139   : > { %v2002_v53 = vpop.f32.mrb[6].mxu1  ;;  %2036 = vmatpush3.bf16.msra.mxu0 %v2084_v29  ;;  %v2514_v29 = vrot.slane %v1147_v10, %v1242_v15 }
 0x13a   : > { %v781_v54 = vpop.f32.mrb[7].mxu1  ;;  %2037 = vmatprep.subr.bf16.mxu0 %v2085_v52 }
 0x13b   : > { %2014 = vmatprep.mubr.msk.f32.mxu0 %vm811_vm2, %v781_v54  ;;  %v2532_v54 = vpop.permute.xlu1 %1360 }
 0x13c   : > { %2015 = vmatmul.mubr.msk.f32.gmra.mrb[6].mxu0 %vm811_vm2, %v2002_v53 }
 0x13d   : > { %v2005_v56 = vpop.f32.mrb[8].mxu1  ;;  %2038 = vmatpush3.bf16.msra.mxu0 %v2085_v52 }
 0x13e   : > { %v791_v57 = vpop.f32.mrb[9].mxu1  ;;  %2039 = vmatprep.subr.bf16.mxu0 %v2086_v55 }
 0x13f   : > { %2017 = vmatprep.mubr.msk.f32.mxu0 %vm811_vm2, %v791_v57 }
 0x140   : > { %2018 = vmatmul.mubr.msk.f32.gmra.mrb[8].mxu0 %vm811_vm2, %v2005_v56 }
 0x141   : > { %v2008_v60 = vpop.f32.mrb[10].mxu1  ;;  %2040 = vmatpush3.bf16.msra.mxu0 %v2086_v55 }
 0x142   : > { %v801_v61 = vpop.f32.mrb[11].mxu1  ;;  %2041 = vmatprep.subr.bf16.mxu0 %v2087_v58 }
 0x143   : > { %2020 = vmatprep.mubr.msk.f32.mxu0 %vm811_vm2, %v801_v61 }
 0x144   : > { %2021 = vmatmul.mubr.msk.f32.gmra.mrb[10].mxu0 %vm811_vm2, %v2008_v60 }
 0x145   : > { %v2029_v0 = vpop.f32.mrb[12].mxu1  ;;  %2042 = vmatpush3.bf16.msra.mxu0 %v2087_v58 }
 0x146   : > { %v1112_v1 = vadd.f32 %v2029_v0, %v2476_v62  ;;  %v1103_v2 = vpop.f32.mrb[13].mxu1 }
 0x147   : > { %v1104_v3 = vadd.f32 %v2476_v62, %v1103_v2  ;;  %v2030_v4 = vpop.f32.mrb[14].mxu1 }
 0x148   : > { %1141 = vst.msk [vmem:[#allocation2 + $0x20] sm:$0xff] %vm1134_vm1, %v1112_v1  ;;  %v1115_v7 = vadd.f32 %v2030_v4, %v2476_v62  ;;  %v1106_v8 = vpop.f32.mrb[15].mxu1 }
 0x149   : > { %1139 = vst.msk [vmem:[#allocation2 + $0x10] sm:$0xff] %vm1134_vm1, %v1104_v3  ;;  %v1107_v12 = vadd.f32 %v2476_v62, %v1106_v8 }
 0x14a   : > { %1142 = vst.msk [vmem:[#allocation2 + $0x28] sm:$0xff] %vm1134_vm1, %v1115_v7 }
 0x14b   : > { %1140 = vst.msk [vmem:[#allocation2 + $0x18] sm:$0xff] %vm1134_vm1, %v1107_v12  ;;  %v2553_v12 = vld [vmem:[%s2863_s6 + $0x8] ss:$0 sm:$0xff] }
 0x14d   : > { %v2033_v26 = vpop.f32.mrb[16].mxu1 }
 0x14e   : > { %v1128_v31 = vadd.f32 %v2033_v26, %v2476_v62  ;;  %v1119_v37 = vpop.f32.mrb[17].mxu1 }
 0x14f   : > { %v1120_v46 = vadd.f32 %v2476_v62, %v1119_v37  ;;  %v2034_v47 = vpop.f32.mrb[18].mxu1  ;;  %v1160_v48 = vld [vmem:[#allocation2 + $0x20] sm:$0xff] }
 0x150   : > { %1145 = vst.msk [vmem:[#allocation2 + $0x40] sm:$0xff] %vm1134_vm1, %v1128_v31  ;;  %v1158_v14 = vld [vmem:[#allocation2 + $0x10] sm:$0xff]  ;;  %v1131_v50 = vadd.f32 %v2034_v47, %v2476_v62  ;;  %v1122_v51 = vpop.f32.mrb[19].mxu1  ;;  %v1172_v52 = vmul.f32 %v2503_v19, %v1160_v48  ;;  %v1184_v53 = vmul.f32 %v2510_v24, %v1160_v48  ;;  %v1204_v59 = vmul.f32 %v2512_v27, %v1160_v48  ;;  %v2569_v48 = vpop.permute.xlu1 %1404 }
 0x151   : > { %v1220_v23 = vld [vmem:[#allocation2 + $0xf] sm:$0xff]  ;;  %v1170_v55 = vmul.f32 %v2503_v19, %v1158_v14  ;;  %v1182_v56 = vmul.f32 %v2510_v24, %v1158_v14  ;;  %1143 = vst.msk [vmem:[#allocation2 + $0x30] sm:$0xff] %vm1134_vm1, %v1120_v46  ;;  %v1123_v3 = vadd.f32 %v2476_v62, %v1122_v51  ;;  %v2567_v47 = vld [vmem:[#allocation2 + $0x27] sm:$0xff] }
 0x152   : > { %v1281_v34 = vld [vmem:[#allocation2 + $0x9] sm:$0xff]  ;;  %v1244_v57 = vmul.f32 %v2514_v29, %v1220_v23  ;;  %v1159_v60 = vld [vmem:[#allocation2 + $0x18] sm:$0xff]  ;;  %v1232_v0 = vmul.f32 %v2507_v20, %v1220_v23  ;;  %1146 = vst.msk [vmem:[#allocation2 + $0x48] sm:$0xff] %vm1134_vm1, %v1131_v50 }
 0x153   : > { %v2538_v58 = vld [vmem:[#allocation2 + $0x28] sm:$0xff]  ;;  %v1221_v61 = vld [vmem:[#allocation2 + $0x17] sm:$0xff]  ;;  %v1293_v2 = vmul.f32 %v2517_v33, %v1281_v34  ;;  %v1171_v5 = vmul.f32 %v2503_v19, %v1159_v60  ;;  %v1183_v7 = vmul.f32 %v2510_v24, %v1159_v60  ;;  %v1190_v8 = vadd.f32 %v1182_v56, %v1169_v41  ;;  %1144 = vst.msk [vmem:[#allocation2 + $0x38] sm:$0xff] %vm1134_vm1, %v1123_v3  ;;  %v1222_v31 = vld [vmem:[#allocation2 + $0x1f] sm:$0xff] }
 0x154   : > { %v1282_v1 = vld [vmem:[#allocation2 + $0x11] sm:$0xff]  ;;  %v1185_v4 = vmul.f32 %v2510_v24, %v2538_v58  ;;  %v1203_v9 = vmul.f32 %v2512_v27, %v1159_v60  ;;  %v1283_v10 = vld [vmem:[#allocation2 + $0x19] sm:$0xff]  ;;  %v1245_v13 = vmul.f32 %v2514_v29, %v1221_v61  ;;  %v1252_v15 = vadd.f32 %v1244_v57, %v1231_v43 }
 0x155   : > { %v1265_v62 = vmul.f32 %v2523_v44, %v1221_v61  ;;  %v1205_v16 = vmul.f32 %v2512_v27, %v2538_v58  ;;  %v1191_v21 = vadd.f32 %v1183_v7, %v1170_v55  ;;  %v1233_v25 = vmul.f32 %v2507_v20, %v1221_v61  ;;  %v1401_v7 = vpop.permute.xlu0 %1400 }
 0x156   : > { %v1211_v22 = vadd.f32 %v1203_v9, %v1190_v8  ;;  %v1294_v26 = vmul.f32 %v2517_v33, %v1282_v1  ;;  %v1295_v41 = vmul.f32 %v2517_v33, %v1283_v10  ;;  %v1306_v43 = vmul.f32 %v2527_v35, %v1282_v1 }
 0x157   : > { %v1273_v37 = vadd.f32 %v1265_v62, %v1252_v15  ;;  %v1307_v46 = vmul.f32 %v2527_v35, %v1283_v10  ;;  %v1253_v14 = vadd.f32 %v1245_v13, %v1232_v0  ;;  %v1327_v23 = vmul.f32 %v2553_v12, %v1283_v10 }
 0x158   : > { %v1192_v34 = vadd.f32 %v1184_v53, %v1171_v5  ;;  %v1193_v50 = vadd.f32 %v1185_v4, %v1172_v52  ;;  %v1314_v51 = vadd.f32 %v1306_v43, %v1293_v2  ;;  %v2573_v56 = vld [vmem:[#allocation2 + $0x30] sm:$0xff]  ;;  %v1212_v57 = vadd.f32 %v1204_v59, %v1191_v21  ;;  %v1284_v52 = vld [vmem:[#allocation2 + $0x21] sm:$0xff] }
 0x159   : > { %v1383_v55 = vmul.f32 %v2491_v11, %v1273_v37  ;;  %v2575_v60 = vld [vmem:[#allocation2 + $0x2f] sm:$0xff]  ;;  %v1234_v61 = vmul.f32 %v2507_v20, %v1222_v31  ;;  %v1315_v1 = vadd.f32 %v1307_v46, %v1294_v26  ;;  %v1206_v3 = vmul.f32 %v2512_v27, %v2573_v56  ;;  %v1409_v26 = vpop.permute.xlu1 %1408 }
 0x15a   : > { %v1246_v0 = vmul.f32 %v2514_v29, %v1222_v31  ;;  %v1247_v53 = vmul.f32 %v2514_v29, %v2567_v47  ;;  %v1335_v2 = vadd.f32 %v1327_v23, %v1314_v51  ;;  %v1213_v11 = vadd.f32 %v1205_v16, %v1192_v34  ;;  %v2584_v59 = vld [vmem:[#allocation2 + $0x29] sm:$0xff]  ;;  %v2590_v15 = vld [vmem:[#allocation2 + $0x31] sm:$0xff] }
 0x15b   : > { %v1391_v4 = vadd.f32 %v1383_v55, %v1211_v22  ;;  %v1266_v5 = vmul.f32 %v2523_v44, %v1222_v31  ;;  %v1267_v10 = vmul.f32 %v2523_v44, %v2567_v47  ;;  %v1268_v13 = vmul.f32 %v2523_v44, %v2575_v60  ;;  %v2606_v55 = vld [vmem:[#allocation2 + $0x38] sm:$0xff] }
 0x15c   : > { %v1254_v8 = vadd.f32 %v1246_v0, %v1233_v25  ;;  %v1255_v9 = vadd.f32 %v1247_v53, %v1234_v61  ;;  %v1431_v62 = vmul.f32 %v1401_v7, %v1335_v2  ;;  %v1296_v22 = vmul.f32 %v2517_v33, %v1284_v52  ;;  %v2597_v25 = vld [vmem:[%s2864_s7] ss:$0 sm:$0xff]  ;;  %v1225_v7 = vld [vmem:[#allocation2 + $0x37] sm:$0xff] }
 0x15d   : > { %v1274_v21 = vadd.f32 %v1266_v5, %v1253_v14  ;;  %v1308_v16 = vmul.f32 %v2527_v35, %v1284_v52  ;;  %v1309_v43 = vmul.f32 %v2527_v35, %v2584_v59  ;;  %v1328_v46 = vmul.f32 %v2553_v12, %v1284_v52 }
 0x15e   : > { %v1275_v31 = vadd.f32 %v1267_v10, %v1254_v8  ;;  %v1276_v37 = vadd.f32 %v1268_v13, %v1255_v9  ;;  %v1439_v23 = vadd.f32 %v1431_v62, %v1391_v4  ;;  %v1329_v14 = vmul.f32 %v2553_v12, %v2584_v59  ;;  %v1198_v8 = vld [vmem:[#allocation2 + $0x50] sm:$0xff]  ;;  %v2614_v13 = vld [vmem:[#allocation2 + $0x40] sm:$0xff] }
 0x15f   : > { %v1316_v34 = vadd.f32 %v1308_v16, %v1295_v41  ;;  %v1330_v51 = vmul.f32 %v2553_v12, %v2590_v15  ;;  %v1317_v61 = vadd.f32 %v1309_v43, %v1296_v22  ;;  %v1336_v0 = vadd.f32 %v1328_v46, %v1315_v1  ;;  %v1322_v62 = vld [vmem:[#allocation2 + $0x51] sm:$0xff]  ;;  %v2620_v16 = vld [vmem:[#allocation2 + $0x3f] sm:$0xff] }
 0x160   : > { %v1384_v53 = vmul.f32 %v2519_v39, %v1274_v21  ;;  %v1385_v2 = vmul.f32 %v2499_v17, %v1275_v31  ;;  %v2611_v5 = vadd.f32 %v2597_v25, %v1439_v23  ;;  %v1214_v52 = vadd.f32 %v1206_v3, %v1193_v50  ;;  %v1413_v39 = vpop.permute.xlu0 %1412  ;;  %v1177_v3 = vld [vmem:[#allocation2 + $0x48] sm:$0xff] }
 0x161   : > { %v1337_v4 = vadd.f32 %v1329_v14, %v1316_v34  ;;  %v1386_v41 = vmul.f32 %v2532_v54, %v1276_v37  ;;  %v1338_v9 = vadd.f32 %v1330_v51, %v1317_v61  ;;  %v1175_v1 = vmul.f32 %v2503_v19, %v2606_v55  ;;  %v1366_v54 = vpop.permute.xlu1 %1365 }
 0x162   : > { %v1392_v10 = vadd.f32 %v1384_v53, %v1212_v57  ;;  %v1463_v17 = vmul.f32 %v2611_v5, %v2611_v5  ;;  %v1393_v21 = vadd.f32 %v1385_v2, %v1213_v11  ;;  %v1432_v31 = vmul.f32 %v2569_v48, %v1336_v0 }
 0x163   : > { %v1394_v22 = vadd.f32 %v1386_v41, %v1214_v52  ;;  %v1433_v50 = vmul.f32 %v1409_v26, %v1337_v4  ;;  %v1434_v57 = vmul.f32 %v1413_v39, %v1338_v9  ;;  %v1237_v37 = vmul.f32 %v2507_v20, %v1225_v7  ;;  %v1239_v4 = vld [vmem:[#allocation2 + $0x47] sm:$0xff] }
 0x164   : > { %v2625_v43 = vmul.f32 %v2512_v27, %v1198_v8  ;;  %v1471_v46 = vmul.f32 %v1463_v17, %v2611_v5  ;;  %v1188_v11 = vmul.f32 %v2510_v24, %v2614_v13  ;;  %v2631_v26 = vmul.f32 %v2553_v12, %v1322_v62 }
 0x165   : > { %v1441_v23 = vadd.f32 %v1433_v50, %v1393_v21  ;;  %v1440_v34 = vadd.f32 %v1432_v31, %v1392_v10  ;;  %v1442_v14 = vadd.f32 %v1434_v57, %v1394_v22  ;;  %v1209_v51 = vmul.f32 %v2512_v27, %v1177_v3  ;;  %v1376_v21 = vpop.permute.xlu1 %1375 }
 0x166   : > { %v1250_v48 = vmul.f32 %v2514_v29, %v2620_v16  ;;  %v1479_v61 = vmul.f32 0.044715, %v1471_v46  ;;  %v1196_v53 = vadd.f32 %v1188_v11, %v1175_v1  ;;  %v2640_v2 = vmul.f32 %v2514_v29, %v1225_v7  ;;  %v1287_v46 = vld [vmem:[#allocation2 + $0x39] sm:$0xff] }
 0x167   : > { %v2637_v0 = vadd.f32 %v2597_v25, %v1441_v23  ;;  %v2643_v52 = vadd.f32 %v2597_v25, %v1442_v14  ;;  %v1173_v8 = vmul.f32 %v2503_v19, %v2538_v58  ;;  %v1186_v9 = vmul.f32 %v2510_v24, %v2573_v56 }
 0x168   : > { %v1258_v41 = vadd.f32 %v1250_v48, %v1237_v37  ;;  %v1207_v1 = vmul.f32 %v2512_v27, %v2606_v55  ;;  %v1235_v62 = vmul.f32 %v2507_v20, %v2567_v47  ;;  %v1248_v17 = vmul.f32 %v2514_v29, %v2575_v60 }
 0x169   : > { %v1465_v10 = vmul.f32 %v2637_v0, %v2637_v0  ;;  %v2658_v39 = vadd.f32 %v2597_v25, %v1440_v34  ;;  %v1466_v58 = vmul.f32 %v2643_v52, %v2643_v52  ;;  %v1194_v22 = vadd.f32 %v1186_v9, %v1173_v8 }
 0x16a   : > { %v1269_v50 = vmul.f32 %v2523_v44, %v1225_v7  ;;  %v2664_v57 = vadd.f32 %v1209_v51, %v1196_v53  ;;  %v1271_v37 = vmul.f32 %v2523_v44, %v1239_v4  ;;  %v1256_v47 = vadd.f32 %v1248_v17, %v1235_v62  ;;  %v1260_v51 = vld [vmem:[#allocation2 + $0x4f] sm:$0xff]  ;;  %v1288_v17 = vld [vmem:[#allocation2 + $0x41] sm:$0xff] }
 0x16b   : > { %v1473_v31 = vmul.f32 %v1465_v10, %v2637_v0  ;;  %v1487_v23 = vadd.f32 %v1479_v61, %v2611_v5  ;;  %v1474_v11 = vmul.f32 %v1466_v58, %v2643_v52  ;;  %v1297_v34 = vmul.f32 %v2517_v33, %v2584_v59 }
 0x16c   : > { %v1310_v14 = vmul.f32 %v2527_v35, %v2590_v15  ;;  %v1279_v7 = vadd.f32 %v1271_v37, %v1258_v41  ;;  %v1215_v8 = vadd.f32 %v1207_v1, %v1194_v22  ;;  %v1277_v9 = vadd.f32 %v1269_v50, %v1256_v47  ;;  %v1301_v41 = vld [vmem:[#allocation2 + $0x49] sm:$0xff]  ;;  %v1381_v50 = vpop.permute.xlu1 %1380 }
 0x16d   : > { %v1481_v48 = vmul.f32 0.044715, %v1473_v31  ;;  %v1482_v53 = vmul.f32 0.044715, %v1474_v11  ;;  %v1331_v62 = vmul.f32 %v2553_v12, %v1287_v46  ;;  %v1176_v61 = vmul.f32 %v2503_v19, %v2614_v13 }
 0x16e   : > { %v1318_v10 = vadd.f32 %v1310_v14, %v1297_v34  ;;  %v1387_v6 = vmul.f32 %v1366_v54, %v1277_v9  ;;  %v1189_v59 = vmul.f32 %v2510_v24, %v1177_v3  ;;  %v1238_v31 = vmul.f32 %v2507_v20, %v2620_v16  ;;  %v1417_v34 = vpop.permute.xlu0 %1416 }
 0x16f   : > { %v1489_v58 = vadd.f32 %v1481_v48, %v2637_v0  ;;  %v1490_v1 = vadd.f32 %v1482_v53, %v2643_v52  ;;  %v1251_v37 = vmul.f32 %v2514_v29, %v1239_v4  ;;  %v1272_v47 = vmul.f32 %v2523_v44, %v1260_v51 }
 0x170   : > { %v1339_v22 = vadd.f32 %v1331_v62, %v1318_v10  ;;  %v1395_v14 = vadd.f32 %v1387_v6, %v1215_v8  ;;  %v1197_v63 = vadd.f32 %v1189_v59, %v1176_v61  ;;  %v1300_v54 = vmul.f32 %v2517_v33, %v1288_v17 }
 0x171   : > { %v1497_v11 = vmul.f32 0.7978846, %v1489_v58  ;;  %v1498_v48 = vmul.f32 0.7978846, %v1490_v1  ;;  %v1259_v9 = vadd.f32 %v1251_v37, %v1238_v31  ;;  %v1313_v45 = vmul.f32 %v2527_v35, %v1301_v41 }
 0x172   : > { %v1435_v3 = vmul.f32 %v1417_v34, %v1339_v22  ;;  %v1495_v40 = vmul.f32 0.7978846, %v1487_v23  ;;  %v1389_v38 = vmul.f32 %v1376_v21, %v1279_v7  ;;  %v1174_v53 = vmul.f32 %v2503_v19, %v2573_v56  ;;  %v1421_v56 = vpop.permute.xlu1 %1420 }
 0x173   : > { %v1187_v29 = vmul.f32 %v2510_v24, %v2606_v55  ;;  %2122 = vtanh.f32 %v1497_v11  ;;  %v1280_v51 = vadd.f32 %v1272_v47, %v1259_v9  ;;  %v1321_v6 = vadd.f32 %v1313_v45, %v1300_v54  ;;  %v1429_v55 = vpop.permute.xlu0 %1428 }
 0x174   : > { %v1443_v4 = vadd.f32 %v1435_v3, %v1395_v14  ;;  %2124 = vtanh.f32 %v1498_v48  ;;  %v1218_v8 = vadd.f32 %v2625_v43, %v1197_v63  ;;  %v1236_v62 = vmul.f32 %v2507_v20, %v2575_v60 }
 0x175   : > { %v1195_v10 = vadd.f32 %v1187_v29, %v1174_v53  ;;  %v1390_v21 = vmul.f32 %v1381_v50, %v1280_v51  ;;  %v1342_v19 = vadd.f32 %v2631_v26, %v1321_v6  ;;  %v1298_v24 = vmul.f32 %v2517_v33, %v2590_v15 }
 0x176   : > { %v2693_v23 = vadd.f32 %v2597_v25, %v1443_v4  ;;  %v1208_v45 = vmul.f32 %v2512_v27, %v2614_v13  ;;  %v1257_v63 = vadd.f32 %v2640_v2, %v1236_v62  ;;  %v1270_v43 = vmul.f32 %v2523_v44, %v2620_v16  ;;  %v1425_v37 = vpop.permute.xlu1 %1424 }
 0x177   : > { %v1311_v20 = vmul.f32 %v2527_v35, %v1287_v46  ;;  %v1398_v7 = vadd.f32 %v1390_v21, %v1218_v8  ;;  %v1438_v26 = vmul.f32 %v1429_v55, %v1342_v19  ;;  %v1299_v61 = vmul.f32 %v2517_v33, %v1287_v46 }
 0x178   : > { %v1467_v60 = vmul.f32 %v2693_v23, %v2693_v23  ;;  %v1278_v58 = vadd.f32 %v1270_v43, %v1257_v63  ;;  %v1332_v59 = vmul.f32 %v2553_v12, %v1288_v17  ;;  %v1312_v27 = vmul.f32 %v2527_v35, %v1288_v17 }
 0x179   : > { %v1319_v15 = vadd.f32 %v1311_v20, %v1298_v24  ;;  %v1446_v2 = vadd.f32 %v1438_v26, %v1398_v7  ;;  %v1216_v31 = vadd.f32 %v1208_v45, %v1195_v10  ;;  %v1464_v44 = vmul.f32 %v2658_v39, %v2658_v39 }
 0x17a   : > { %v1475_v13 = vmul.f32 %v1467_v60, %v2693_v23  ;;  %v1388_v1 = vmul.f32 %v2560_v18, %v1278_v58  ;;  %v1320_v22 = vadd.f32 %v1312_v27, %v1299_v61  ;;  %v1333_v50 = vmul.f32 %v2553_v12, %v1301_v41 }
 0x17b   : > { %v1340_v16 = vadd.f32 %v1332_v59, %v1319_v15  ;;  %2126 = vtanh.f32 %v1495_v40  ;;  %v2715_v46 = vadd.f32 %v2597_v25, %v1446_v2  ;;  %v1472_v35 = vmul.f32 %v1464_v44, %v2658_v39 }
 0x17c   : > { %v1483_v33 = vmul.f32 0.044715, %v1475_v13  ;;  %v1397_v17 = vadd.f32 %v1389_v38, %v2664_v57  ;;  %v1396_v47 = vadd.f32 %v1388_v1, %v1216_v31  ;;  %v1341_v34 = vadd.f32 %v1333_v50, %v1320_v22  ;;  %v1920_v31 = vld [vmem:[%s2865_s8] ss:$0 sm:$0xff] }
 0x17d   : > { %v1436_v11 = vmul.f32 %v1421_v56, %v1340_v16  ;;  %v2123_v14 = vpop.eup %2122  ;;  %v1470_v18 = vmul.f32 %v2715_v46, %v2715_v46  ;;  %v1480_v12 = vmul.f32 0.044715, %v1472_v35 }
 0x17e   : > { %v1491_v54 = vadd.f32 %v1483_v33, %v2693_v23  ;;  %v2125_v40 = vpop.eup %2124  ;;  %v1437_v48 = vmul.f32 %v1425_v37, %v1341_v34  ;;  %v1513_v45 = vadd.f32 1.0, %v2123_v14 }
 0x17f   : > { %v1444_v41 = vadd.f32 %v1436_v11, %v1396_v47  ;;  %v1478_v3 = vmul.f32 %v1470_v18, %v2715_v46  ;;  %v1488_v9 = vadd.f32 %v1480_v12, %v2658_v39  ;;  %v1514_v19 = vadd.f32 1.0, %v2125_v40 }
 0x180   : > { %v1499_v53 = vmul.f32 0.7978846, %v1491_v54  ;;  %v1445_v57 = vadd.f32 %v1437_v48, %v1397_v17 }
 0x181   : > { %v1459_v38 = vadd.f32 %v2597_v25, %v1444_v41  ;;  %v1486_v29 = vmul.f32 0.044715, %v1478_v3  ;;  %v1496_v4 = vmul.f32 0.7978846, %v1488_v9  ;;  %v1522_v60 = vmul.f32 0.5, %v1514_v19 }
 0x182   : > { %v1460_v6 = vadd.f32 %v2597_v25, %v1445_v57  ;;  %v1521_v25 = vmul.f32 0.5, %v1513_v45 }
 0x183   : > { %v1468_v51 = vmul.f32 %v1459_v38, %v1459_v38  ;;  %v1494_v8 = vadd.f32 %v1486_v29, %v2715_v46  ;;  %2128 = vtanh.f32 %v1496_v4  ;;  %v1530_v59 = vmul.f32 %v1522_v60, %v2643_v52 }
 0x184   : > { %2130 = vtanh.f32 %v1499_v53  ;;  %v1469_v62 = vmul.f32 %v1460_v6, %v1460_v6  ;;  %v1529_v2 = vmul.f32 %v1521_v25, %v2637_v0 }
 0x185   : > { %v1476_v10 = vmul.f32 %v1468_v51, %v1459_v38  ;;  %v2127_v21 = vpop.eup %2126  ;;  %v1502_v56 = vmul.f32 0.7978846, %v1494_v8  ;;  %v1544_v22 = vmul.f32 %v1920_v31, %v1530_v59  ;;  %v1030_v8 = vrot.slane %v2455_v49, 4  ;;  %v2883_v59 = vld [vmem:[#allocation5_spill] sm:$0xff] }
 0x186   : > { %v1477_v55 = vmul.f32 %v1469_v62, %v1460_v6  ;;  %v1511_v20 = vadd.f32 1.0, %v2127_v21  ;;  %v1543_v35 = vmul.f32 %v1920_v31, %v1529_v2  ;;  %v2884_v2 = vld [vmem:[#allocation4_spill] sm:$0xff] }
 0x187   : > { %v1484_v24 = vmul.f32 0.044715, %v1476_v10  ;;  %2132 = vtanh.f32 %v1502_v56 }
 0x188   : > { %v1485_v43 = vmul.f32 0.044715, %v1477_v55  ;;  %v1519_v58 = vmul.f32 0.5, %v1511_v20  ;;  %v1550_v47 = vpack.c.bf16 %v1544_v22, %v1543_v35 }
 0x189   : > { %v1492_v63 = vadd.f32 %v1484_v24, %v1459_v38 }
 0x18a   : > { %v1493_v26 = vadd.f32 %v1485_v43, %v1460_v6  ;;  %v1527_v16 = vmul.f32 %v1519_v58, %v2611_v5 }
 0x18b   : > { %v1500_v7 = vmul.f32 0.7978846, %v1492_v63 }
 0x18c   : > { %v1501_v61 = vmul.f32 0.7978846, %v1493_v26  ;;  %v1541_v52 = vmul.f32 %v1920_v31, %v1527_v16 }
 0x18d   : > { %2134 = vtanh.f32 %v1500_v7  ;;  %v2129_v15 = vpop.eup %2128  ;;  %v2882_v7 = vld [vmem:[#allocation3_spill] sm:$0xff] }
 0x18e   : > { %v2131_v27 = vpop.eup %2130  ;;  %2136 = vtanh.f32 %v1501_v61  ;;  %v1512_v13 = vadd.f32 1.0, %v2129_v15 }
 0x18f   : > { %v1515_v50 = vadd.f32 1.0, %v2131_v27 }
 0x190   : > { %v1520_v44 = vmul.f32 0.5, %v1512_v13 }
 0x191   : > { %v2133_v1 = vpop.eup %2132  ;;  %v1523_v11 = vmul.f32 0.5, %v1515_v50 }
 0x192   : > { %v1528_v33 = vmul.f32 %v1520_v44, %v2658_v39  ;;  %v1518_v37 = vadd.f32 1.0, %v2133_v1 }
 0x193   : > { %v1531_v12 = vmul.f32 %v1523_v11, %v2693_v23 }
 0x194   : > { %v1542_v17 = vmul.f32 %v1920_v31, %v1528_v33  ;;  %v1526_v34 = vmul.f32 0.5, %v1518_v37 }
 0x195   : > { %v1545_v3 = vmul.f32 %v1920_v31, %v1531_v12 }
 0x196   : > { %v1549_v14 = vpack.c.bf16 %v1542_v17, %v1541_v52  ;;  %v1534_v39 = vmul.f32 %v1526_v34, %v2715_v46 }
 0x197   : > { %v2135_v0 = vpop.eup %2134 }
 0x198   : > { %v1516_v54 = vadd.f32 1.0, %v2135_v0  ;;  %v2137_v18 = vpop.eup %2136  ;;  %2043 = vmatprep.mubr.msk.bf16.mxu0 %vm1134_vm1, %v1549_v14  ;;  %v1548_v57 = vmul.f32 %v1920_v31, %v1534_v39  ;;  %v1921_v14 = vld [vmem:[%s2867_s10] ss:$0 sm:$0xff] }
 0x199   : > { %2044 = vmatmul.mubr.msk.bf16.vlgmr.msra.gmra.mrb[12].mxu0 %vm1134_vm1, %v1550_v47  ;;  %v1517_v40 = vadd.f32 1.0, %v2137_v18 }
 0x19a   : > { %v1524_v5 = vmul.f32 0.5, %v1516_v54 }
 0x19b   : > { %v1525_v48 = vmul.f32 0.5, %v1517_v40 }
 0x19c   : > { %v1532_v41 = vmul.f32 %v1524_v5, %v1459_v38  ;;  %v1031_v38 = vadd.f32 %v1030_v8, %v2455_v49 }
 0x19d   : > { %v1533_v53 = vmul.f32 %v1525_v48, %v1460_v6 }
 0x19e   : > { %v1546_v9 = vmul.f32 %v1920_v31, %v1532_v41  ;;  %v1032_v63 = vrot.slane %v1031_v38, 2 }
 0x19f   : > { %v1547_v4 = vmul.f32 %v1920_v31, %v1533_v53 }
 0x1a0   : > { %v1551_v29 = vpack.c.bf16 %v1546_v9, %v1545_v3  ;;  %v1033_v25 = vadd.f32 %v1032_v63, %v1031_v38 }
 0x1a1   : > { %v1552_v51 = vpack.c.bf16 %v1548_v57, %v1547_v4 }
 0x1a2   : > { %2047 = vmatprep.mubr.msk.bf16.mxu0 %vm1134_vm1, %v1551_v29  ;;  %v1034_v44 = vrot.slane %v1033_v25, 1 }
 0x1a3   : > { %2048 = vmatmul.mubr.msk.bf16.gmra.mrb[16].mxu0 %vm1134_vm1, %v1552_v51 }
 0x1a4   : > { %v1035_v50 = vadd.f32 %v1034_v44, %v1033_v25 }
 0x1a6   : > { %2138 = vrcp.f32 %v1035_v50 }
 0x1b0   : > { %v2139_v34 = vpop.eup %2138 }
 0x20b   : > { %v2013_v10 = vpop.f32.mrb[4].mxu0 }
 0x20c   : > { %v987_v23 = vmul.f32 %v2420_v28, %v2013_v10  ;;  %v902_v62 = vpop.f32.mrb[5].mxu0 }
 0x20d   : > { %v986_v46 = vmul.f32 %v2425_v30, %v902_v62 }
 0x20e   : > { %v995_v6 = vsel %vm524_vm0, %v987_v23, 0.0 }
 0x20f   : > { %v994_v21 = vsel %vm524_vm0, %v986_v46, 0.0  ;;  %v2016_v19 = vpop.f32.mrb[6].mxu0 }
 0x210   : > { %v996_v56 = vadd.f32 %v995_v6, %v994_v21  ;;  %v989_v24 = vmul.f32 %v2429_v32, %v2016_v19  ;;  %v912_v55 = vpop.f32.mrb[7].mxu0 }
 0x211   : > { %v988_v45 = vmul.f32 %v2433_v36, %v912_v55 }
 0x212   : > { %v999_v49 = vsel %vm524_vm0, %v989_v24, 0.0 }
 0x213   : > { %v997_v43 = vsel %vm524_vm0, %v988_v45, 0.0  ;;  %v2019_v28 = vpop.f32.mrb[8].mxu0 }
 0x214   : > { %v998_v20 = vadd.f32 %v997_v43, %v996_v56  ;;  %v991_v30 = vmul.f32 %v2441_v42, %v2019_v28  ;;  %v922_v60 = vpop.f32.mrb[9].mxu0 }
 0x215   : > { %v990_v26 = vmul.f32 %v2882_v7, %v922_v60 }
 0x216   : > { %v1000_v61 = vadd.f32 %v999_v49, %v998_v20  ;;  %v1003_v13 = vsel %vm524_vm0, %v991_v30, 0.0 }
 0x217   : > { %v1001_v58 = vsel %vm524_vm0, %v990_v26, 0.0  ;;  %v2022_v32 = vpop.f32.mrb[10].mxu0 }
 0x218   : > { %v1002_v15 = vadd.f32 %v1001_v58, %v1000_v61  ;;  %v993_v36 = vmul.f32 %v2883_v59, %v2022_v32  ;;  %v932_v27 = vpop.f32.mrb[11].mxu0 }
 0x219   : > { %v992_v31 = vmul.f32 %v2884_v2, %v932_v27 }
 0x21a   : > { %v1004_v42 = vadd.f32 %v1003_v13, %v1002_v15  ;;  %v1007_v22 = vsel %vm524_vm0, %v993_v36, 0.0 }
 0x21b   : > { %v1005_v16 = vsel %vm524_vm0, %v992_v31, 0.0 }
 0x21c   : > { %v1006_v1 = vadd.f32 %v1005_v16, %v1004_v42 }
 0x21e   : > { %v1008_v33 = vadd.f32 %v1007_v22, %v1006_v1 }
 0x220   : > { %v1009_v37 = vrot.slane %v1008_v33, 4 }
 0x222   : > { %v1010_v35 = vadd.f32 %v1009_v37, %v1008_v33 }
 0x224   : > { %v1011_v52 = vrot.slane %v1010_v35, 2 }
 0x226   : > { %v1012_v17 = vadd.f32 %v1011_v52, %v1010_v35 }
 0x228   : > { %v1013_v47 = vrot.slane %v1012_v17, 1 }
 0x22a   : > { %v1014_v11 = vadd.f32 %v1013_v47, %v1012_v17 }
 0x22c   : > { %v2758_v0 = vmul.f32 %v2139_v34, %v1014_v11 }
 0x26c   : > { %v2045_v54 = vpop.f32.mrb[12].mxu0 }
 0x26d   : > { %v1647_v18 = vadd.f32 %v2045_v54, %v1921_v14  ;;  %v1638_v5 = vpop.f32.mrb[13].mxu0 }
 0x26e   : > { %v1639_v12 = vadd.f32 %v1921_v14, %v1638_v5  ;;  %v2046_v40 = vpop.f32.mrb[14].mxu0 }
 0x26f   : > { %v1641_v39 = vpop.f32.mrb[15].mxu0  ;;  %v1675_v41 = vsel %vm524_vm0, %v1647_v18, 0.0  ;;  %v1650_v48 = vadd.f32 %v2046_v40, %v1921_v14 }
 0x270   : > { %v1642_v3 = vadd.f32 %v1921_v14, %v1641_v39  ;;  %1676 = vadd.xlane.f32.xlu0 %v1675_v41  ;;  %v1669_v9 = vsel %vm524_vm0, %v1639_v12, 0.0 }
 0x271   : > { %1670 = vadd.xlane.f32.xlu1 %v1669_v9  ;;  %v1678_v57 = vsel %vm524_vm0, %v1650_v48, 0.0 }
 0x272   : > { %v1672_v53 = vsel %vm524_vm0, %v1642_v3, 0.0 }
 0x274   : > { %1673 = vadd.xlane.f32.xlu0 %v1672_v53 }
 0x275   : > { %1679 = vadd.xlane.f32.xlu1 %v1678_v57 }
 0x276   : > { %v2049_v29 = vpop.f32.mrb[16].mxu0 }
 0x277   : > { %v1654_v4 = vpop.f32.mrb[17].mxu0  ;;  %v1663_v23 = vadd.f32 %v2049_v29, %v1921_v14 }
 0x278   : > { %v1655_v51 = vadd.f32 %v1921_v14, %v1654_v4  ;;  %v2050_v8 = vpop.f32.mrb[18].mxu0 }
 0x279   : > { %v1657_v10 = vpop.f32.mrb[19].mxu0  ;;  %v1666_v38 = vadd.f32 %v2050_v8, %v1921_v14  ;;  %v1687_v21 = vsel %vm524_vm0, %v1663_v23, 0.0 }
 0x27a   : > { %v1658_v62 = vadd.f32 %v1921_v14, %v1657_v10  ;;  %v1681_v46 = vsel %vm524_vm0, %v1655_v51, 0.0  ;;  %v1044_v10 = vld [vmem:[%s2870_s13] sm:$0x1] }
 0x27b   : > { %1682 = vadd.xlane.f32.xlu0 %v1681_v46  ;;  %v1690_v19 = vsel %vm524_vm0, %v1666_v38, 0.0 }
 0x27c   : > { %v1684_v6 = vsel %vm524_vm0, %v1658_v62, 0.0 }
 0x27d   : > { %1685 = vadd.xlane.f32.xlu1 %v1684_v6 }
 0x27f   : > { %1688 = vadd.xlane.f32.xlu0 %v1687_v21 }
 0x281   : > { %1691 = vadd.xlane.f32.xlu1 %v1690_v19 }
 0x2fd   : > { %v1677_v56 = vpop.xlane.xlu0 %1676 }
 0x2fe   : > { %v1696_v24 = vmul.f32 0.03125, %v1677_v56  ;;  %v1671_v55 = vpop.xlane.xlu1 %1670  ;;  %v1930_v56 = vld [vmem:[%s2868_s11] ss:$0 sm:$0xff] }
 0x2ff   : > { %v1694_v45 = vmul.f32 0.03125, %v1671_v55 }
 0x300   : > { %v2771_v63 = vsub.f32 %v1647_v18, %v1696_v24  ;;  %v1910_v18 = vmul.f32 -1.442695, %v2758_v0 }
 0x301   : > { %v2773_v43 = vsub.f32 %v1639_v12, %v1694_v45  ;;  %v1674_v28 = vpop.xlane.xlu0 %1673 }
 0x302   : > { %v1695_v20 = vmul.f32 0.03125, %v1674_v28  ;;  %v1680_v30 = vpop.xlane.xlu1 %1679  ;;  %v1712_v60 = vmul.f32 %v2771_v63, %v2771_v63  ;;  %2140 = vpow2.f32 %v1910_v18 }
 0x303   : > { %v1697_v49 = vmul.f32 0.03125, %v1680_v30  ;;  %v1710_v26 = vmul.f32 %v2773_v43, %v2773_v43 }
 0x304   : > { %v1724_v7 = vsel %vm524_vm0, %v1712_v60, 0.0  ;;  %v2780_v25 = vsub.f32 %v1642_v3, %v1695_v20  ;;  %v1931_v20 = vld [vmem:[%s2869_s12] ss:$0 sm:$0xff] }
 0x305   : > { %v2782_v61 = vsub.f32 %v1650_v48, %v1697_v49  ;;  %1725 = vadd.xlane.f32.xlu0 %v1724_v7  ;;  %v1718_v15 = vsel %vm524_vm0, %v1710_v26, 0.0 }
 0x306   : > { %v1711_v27 = vmul.f32 %v2780_v25, %v2780_v25 }
 0x307   : > { %v1713_v58 = vmul.f32 %v2782_v61, %v2782_v61 }
 0x308   : > { %v1683_v32 = vpop.xlane.xlu0 %1682  ;;  %v1721_v22 = vsel %vm524_vm0, %v1711_v27, 0.0 }
 0x309   : > { %v1698_v59 = vmul.f32 0.03125, %v1683_v32  ;;  %1719 = vadd.xlane.f32.xlu0 %v1718_v15  ;;  %v1727_v36 = vsel %vm524_vm0, %v1713_v58, 0.0  ;;  %v2885_v58 = vld [vmem:[#allocation6_spill] sm:$0xff] }
 0x30a   : > { %v1686_v13 = vpop.xlane.xlu1 %1685  ;;  %1728 = vadd.xlane.f32.xlu1 %v1727_v36  ;;  %v2886_v32 = vsub.s32 0, %v2885_v58 }
 0x30b   : > { %v2790_v2 = vsub.f32 %v1655_v51, %v1698_v59  ;;  %v1699_v31 = vmul.f32 0.03125, %v1686_v13 }
 0x30c   : > { %v1689_v44 = vpop.xlane.xlu0 %1688  ;;  %v2141_v5 = vpop.eup %2140 }
 0x30d   : > { %v2792_v42 = vsub.f32 %v1658_v62, %v1699_v31  ;;  %v1700_v16 = vmul.f32 0.03125, %v1689_v44  ;;  %v1714_v1 = vmul.f32 %v2790_v2, %v2790_v2  ;;  %v1041_v12 = vadd.f32 1.0, %v2141_v5 }
 0x30e   : > { %v1692_v50 = vpop.xlane.xlu1 %1691  ;;  %1722 = vadd.xlane.f32.xlu1 %v1721_v22 }
 0x30f   : > { %v2797_v33 = vsub.f32 %v1663_v23, %v1700_v16  ;;  %v1701_v37 = vmul.f32 0.03125, %v1692_v50  ;;  %v1730_v35 = vsel %vm524_vm0, %v1714_v1, 0.0  ;;  %v1715_v52 = vmul.f32 %v2792_v42, %v2792_v42 }
 0x310   : > { %1731 = vadd.xlane.f32.xlu0 %v1730_v35  ;;  %2142 = vrcp.f32 %v1041_v12 }
 0x311   : > { %v2802_v17 = vsub.f32 %v1666_v38, %v1701_v37  ;;  %v1716_v47 = vmul.f32 %v2797_v33, %v2797_v33  ;;  %v1733_v11 = vsel %vm524_vm0, %v1715_v52, 0.0 }
 0x312   : > { %1734 = vadd.xlane.f32.xlu1 %v1733_v11 }
 0x313   : > { %v1736_v34 = vsel %vm524_vm0, %v1716_v47, 0.0  ;;  %v1717_v14 = vmul.f32 %v2802_v17, %v2802_v17 }
 0x314   : > { %1737 = vadd.xlane.f32.xlu0 %v1736_v34 }
 0x315   : > { %v1739_v54 = vsel %vm524_vm0, %v1717_v14, 0.0 }
 0x316   : > { %1740 = vadd.xlane.f32.xlu1 %v1739_v54 }
 0x31a   : > { %v2143_v0 = vpop.eup %2142 }
 0x31b   : > { %v1045_v19 = vmul.f32 %v2143_v0, %v1044_v10 }
 0x31d   : > { %v1807_v15 = vrot.slane %v1045_v19, %v2886_v32 }
 0x392   : > { %v1726_v40 = vpop.xlane.xlu0 %1725 }
 0x393   : > { %v1744_v39 = vmul.f32 0.03125, %v1726_v40 }
 0x395   : > { %v1752_v41 = vadd.f32 1e-05, %v1744_v39 }
 0x396   : > { %v1720_v48 = vpop.xlane.xlu0 %1719 }
 0x397   : > { %2144 = vrsqrt.f32 %v1752_v41  ;;  %v1742_v3 = vmul.f32 0.03125, %v1720_v48  ;;  %v1729_v9 = vpop.xlane.xlu1 %1728 }
 0x398   : > { %v1745_v53 = vmul.f32 0.03125, %v1729_v9 }
 0x399   : > { %v1750_v57 = vadd.f32 1e-05, %v1742_v3 }
 0x39a   : > { %v1753_v29 = vadd.f32 1e-05, %v1745_v53 }
 0x39b   : > { %2146 = vrsqrt.f32 %v1750_v57  ;;  %v1723_v4 = vpop.xlane.xlu1 %1722 }
 0x39c   : > { %2148 = vrsqrt.f32 %v1753_v29  ;;  %v1743_v51 = vmul.f32 0.03125, %v1723_v4 }
 0x39d   : > { %v1732_v8 = vpop.xlane.xlu0 %1731 }
 0x39e   : > { %v1746_v23 = vmul.f32 0.03125, %v1732_v8  ;;  %v1751_v62 = vadd.f32 1e-05, %v1743_v51 }
 0x39f   : > { %v1735_v46 = vpop.xlane.xlu1 %1734 }
 0x3a0   : > { %v1754_v38 = vadd.f32 1e-05, %v1746_v23  ;;  %2150 = vrsqrt.f32 %v1751_v62  ;;  %v1747_v6 = vmul.f32 0.03125, %v1735_v46 }
 0x3a1   : > { %v2145_v21 = vpop.eup %2144  ;;  %v1738_v24 = vpop.xlane.xlu0 %1737 }
 0x3a2   : > { %v1768_v55 = vmul.f32 %v2145_v21, %v2771_v63  ;;  %2152 = vrsqrt.f32 %v1754_v38  ;;  %v1748_v45 = vmul.f32 0.03125, %v1738_v24  ;;  %v1755_v28 = vadd.f32 1e-05, %v1747_v6 }
 0x3a3   : > { %v1741_v30 = vpop.xlane.xlu1 %1740 }
 0x3a4   : > { %v1783_v60 = vmul.f32 %v1930_v56, %v1768_v55  ;;  %v1756_v49 = vadd.f32 1e-05, %v1748_v45  ;;  %2154 = vrsqrt.f32 %v1755_v28  ;;  %v1749_v7 = vmul.f32 0.03125, %v1741_v30 }
 0x3a5   : > { %v2147_v26 = vpop.eup %2146 }
 0x3a6   : > { %v2149_v59 = vpop.eup %2148  ;;  %v1798_v36 = vadd.f32 %v1931_v20, %v1783_v60  ;;  %v1766_v63 = vmul.f32 %v2147_v26, %v2773_v43  ;;  %2156 = vrsqrt.f32 %v1756_v49  ;;  %v1757_v27 = vadd.f32 1e-05, %v1749_v7 }
 0x3a7   : > { %v1769_v13 = vmul.f32 %v2149_v59, %v2782_v61 }
 0x3a8   : > { %v1810_v31 = vmul.f32 %v1807_v15, %v1798_v36  ;;  %v1781_v44 = vmul.f32 %v1930_v56, %v1766_v63  ;;  %2158 = vrsqrt.f32 %v1757_v27 }
 0x3a9   : > { %v1784_v16 = vmul.f32 %v1930_v56, %v1769_v13 }
 0x3aa   : > { %v2151_v1 = vpop.eup %2150  ;;  %1818 = vst.msk [vmem:[%s2830_s25 + $0x10] sm:$0xff] %vm524_vm0, %v1810_v31  ;;  %v1796_v43 = vadd.f32 %v1931_v20, %v1781_v44 }
 0x3ab   : > { %v1799_v22 = vadd.f32 %v1931_v20, %v1784_v16  ;;  %v1767_v50 = vmul.f32 %v2151_v1, %v2780_v25 }
 0x3ac   : > { %v2153_v37 = vpop.eup %2152  ;;  %v1808_v35 = vmul.f32 %v1807_v15, %v1796_v43 }
 0x3ad   : > { %v1811_v52 = vmul.f32 %v1807_v15, %v1799_v22  ;;  %v1770_v47 = vmul.f32 %v2153_v37, %v2790_v2  ;;  %v1782_v61 = vmul.f32 %v1930_v56, %v1767_v50 }
 0x3ae   : > { %v2155_v11 = vpop.eup %2154  ;;  %1816 = vst.msk [vmem:[%s2830_s25] sm:$0xff] %vm524_vm0, %v1808_v35 }
 0x3af   : > { %1819 = vst.msk [vmem:[%s2830_s25 + $0x18] sm:$0xff] %vm524_vm0, %v1811_v52  ;;  %v1785_v34 = vmul.f32 %v1930_v56, %v1770_v47  ;;  %v1797_v14 = vadd.f32 %v1931_v20, %v1782_v61  ;;  %v1771_v54 = vmul.f32 %v2155_v11, %v2792_v42 }
 0x3b0   : > { %v2157_v18 = vpop.eup %2156 }
 0x3b1   : > { %v1800_v25 = vadd.f32 %v1931_v20, %v1785_v34  ;;  %v1809_v5 = vmul.f32 %v1807_v15, %v1797_v14  ;;  %v1772_v12 = vmul.f32 %v2157_v18, %v2797_v33  ;;  %v1786_v40 = vmul.f32 %v1930_v56, %v1771_v54 }
 0x3b2   : > { %v2159_v2 = vpop.eup %2158 }
 0x3b3   : > { %v1812_v39 = vmul.f32 %v1807_v15, %v1800_v25  ;;  %1817 = vst.msk [vmem:[%s2830_s25 + $0x8] sm:$0xff] %vm524_vm0, %v1809_v5  ;;  %v1787_v41 = vmul.f32 %v1930_v56, %v1772_v12  ;;  %v1801_v48 = vadd.f32 %v1931_v20, %v1786_v40  ;;  %v1773_v3 = vmul.f32 %v2159_v2, %v2802_v17 }
 0x3b5   : > { %1820 = vst.msk [vmem:[%s2830_s25 + $0x20] sm:$0xff] %vm524_vm0, %v1812_v39  ;;  %v1802_v42 = vadd.f32 %v1931_v20, %v1787_v41  ;;  %v1813_v9 = vmul.f32 %v1807_v15, %v1801_v48  ;;  %v1788_v53 = vmul.f32 %v1930_v56, %v1773_v3 }
 0x3b7   : > { %v1814_v57 = vmul.f32 %v1807_v15, %v1802_v42  ;;  %1821 = vst.msk [vmem:[%s2830_s25 + $0x28] sm:$0xff] %vm524_vm0, %v1813_v9  ;;  %v1803_v29 = vadd.f32 %v1931_v20, %v1788_v53 }
 0x3b9   : > { %1822 = vst.msk [vmem:[%s2830_s25 + $0x30] sm:$0xff] %vm524_vm0, %v1814_v57  ;;  %v1815_v33 = vmul.f32 %v1807_v15, %v1803_v29 }
 0x3bb   : > { %1823 = vst.msk [vmem:[%s2830_s25 + $0x38] sm:$0xff] %vm524_vm0, %v1815_v33 }
 0x3bc PF: > { %s25_s18 = sadd.s32 1, %s2166_s18  }
 0x3bd   : > { %p22_p4 = scmp.ge.s32.totalorder %s25_s18, 4  }
 0x3bf   :  { %24 = sbr.rel (!%p22_p4) target bundleno = 1 (0x1), region = 110 }

</bundles_post_ra>
